<compile_context>
chip_gen: v7x
topology: tpu7x:2x2x1
jax: 0.10.0
libtpu: 0.0.40
codegen_flags: <defaults>
</compile_context>

<pallas_src>
import functools

import jax
import jax.numpy as jnp
from jax.experimental import pallas as pl
from jax.experimental.pallas import tpu as pltpu


# ----------------------------------------------------------------------------
# Fully fused MHA kernel: one batch *block* per grid step.
# ----------------------------------------------------------------------------
def _mha_fused_kernel(q_ref, k_ref, v_ref, wq_ref, wk_ref, wv_ref,
                      pw_ref, pb_ref, g_ref, beta_ref, o_ref, a_ref=None,
                      *, num_heads, dq, dk, dv, eps, write_attn,
                      mxu_dtype, attn_dtype):
    bblk, lq, u = q_ref.shape
    lk = k_ref.shape[1]

    # Residual / LayerNorm inputs stay f32; only MXU operands get cast.
    xq = q_ref[...].reshape(bblk * lq, u)                     # (M,  U)
    xk = k_ref[...].reshape(bblk * lk, u)                     # (Mk, U)
    xv = v_ref[...].reshape(bblk * lk, u)                     # (Mk, U)

    # Fused, lane-dense projections with the batch folded into the GEMM M dim.
    # The softmax temperature 1/sqrt(num_units) is pre-folded into wq_ref.
    qf = jnp.dot(xq.astype(mxu_dtype), wq_ref[...],
                 preferred_element_type=jnp.float32)          # (M,  H*Dq)
    kf = jnp.dot(xk.astype(mxu_dtype), wk_ref[...],
                 preferred_element_type=jnp.float32)          # (Mk, H*Dk)
    vf = jnp.dot(xv.astype(mxu_dtype), wv_ref[...],
                 preferred_element_type=jnp.float32)          # (Mk, H*Dv)
    qf = qf.astype(mxu_dtype)
    kf = kf.astype(mxu_dtype)
    vf = vf.astype(mxu_dtype)

    ctx_rows = []
    for b in range(bblk):                                     # static unroll
        qb = qf[b * lq:(b + 1) * lq]
        kb = kf[b * lk:(b + 1) * lk]
        vb = vf[b * lk:(b + 1) * lk]
        ctx_heads = []
        for h in range(num_heads):                            # static unroll
            qh = qb[:, h * dq:(h + 1) * dq]                   # (Lq, Dq)
            kh = kb[:, h * dk:(h + 1) * dk]                   # (Lk, Dk)
            vh = vb[:, h * dv:(h + 1) * dv]                   # (Lk, Dv)

            # QK^T without explicit transpose: contract last dims on the MXU.
            s = jax.lax.dot_general(qh, kh, (((1,), (1,)), ((), ())),
                                    preferred_element_type=jnp.float32)
            # TODO(synk): attn_mask hook + flash-style Lk tiling would go here.
            m = jnp.max(s, axis=-1, keepdims=True)
            e = jnp.exp(s - m)
            denom = jnp.sum(e, axis=-1, keepdims=True)
            if write_attn:
                # User-visible probabilities: exact reciprocal so rows sum to 1.
                p = e / denom
                a_ref[h, b] = p.astype(attn_dtype)
            else:
                # Hot path: EUP approximate reciprocal (separate slot, ~free).
                p = e * pl.reciprocal(denom, approx=True)
            ctx_heads.append(jnp.dot(p.astype(mxu_dtype), vh,
                                     preferred_element_type=jnp.float32))
        ctx_rows.append(jnp.concatenate(ctx_heads, axis=-1))  # (Lq, H*Dv)
    ctx = jnp.concatenate(ctx_rows, axis=0)                   # (M,  H*Dv)

    # Head-concat + output projection as ONE (M, H*Dv) @ (H*Dv, U) matmul.
    y = jnp.dot(ctx.astype(mxu_dtype), pw_ref[...],
                preferred_element_type=jnp.float32)           # (M, U)
    y = y + pb_ref[...] + xq                                  # bias + residual

    # One-pass LayerNorm (E[y^2] - E[y]^2); dropouts are identity in eval mode.
    mean = jnp.mean(y, axis=-1, keepdims=True)
    var = jnp.mean(y * y, axis=-1, keepdims=True) - mean * mean
    o_ref[...] = (((y - mean) * jax.lax.rsqrt(var + eps)) * g_ref[...]
                  + beta_ref[...]).reshape(bblk, lq, u)


def _pick_batch_block(batch, lq):
    """Target >=~128 GEMM rows per step but keep >=2 parallel steps (v7x)."""
    bb = max(1, min(batch, max(1, 256 // max(lq, 1))))
    if batch >= 2:
        bb = min(bb, max(1, batch // 2))
    while batch % bb:
        bb -= 1
    return bb


# ----------------------------------------------------------------------------
# MultiHeadAttention wrapper
# ----------------------------------------------------------------------------
class MultiHeadAttentionPallas:
    def __init__(self, num_heads, num_units, query_dim, key_dim, value_dim, key,
                 eps=1e-6):
        assert query_dim == key_dim
        self.num_heads = num_heads
        self.num_units = num_units
        self.query_dim = query_dim
        self.key_dim = key_dim
        self.value_dim = value_dim
        # NOTE: the source module uses a custom LayerNorm (eps not shown); the
        # common implementation uses eps=1e-6 (nn.LayerNorm default would be 1e-5).
        self.eps = eps

        k = jax.random.split(key, 5)

        def xavier_normal(rng, shape, fan_in, fan_out):
            std = (2.0 / (fan_in + fan_out)) ** 0.5
            return std * jax.random.normal(rng, shape, dtype=jnp.float32)

        # Original per-head weights (kept for the pure-JAX reference).
        self.wq = xavier_normal(k[0], (num_heads, num_units, query_dim), num_units, query_dim)
        self.wk = xavier_normal(k[1], (num_heads, num_units, key_dim), num_units, key_dim)
        self.wv = xavier_normal(k[2], (num_heads, num_units, value_dim), num_units, value_dim)
        proj_in = num_heads * value_dim
        bound = 1.0 / proj_in ** 0.5
        self.proj_w = jax.random.uniform(
            k[3], (proj_in, num_units), minval=-bound, maxval=bound, dtype=jnp.float32)
        self.proj_b = jax.random.uniform(
            k[4], (num_units,), minval=-bound, maxval=bound, dtype=jnp.float32)
        self.ln_gamma = jnp.ones((num_units,), jnp.float32)
        self.ln_beta = jnp.zeros((num_units,), jnp.float32)

        # Kernel-friendly layouts (f32 masters): lane-dense fused projection
        # weights with the 1/sqrt(num_units) temperature folded into Wq; the
        # output-projection weight is used flat (H*Dv, U) so concat ordering
        # matches torch.cat(torch.split(...)) head-major stacking.
        inv_temper = 1.0 / float(num_units) ** 0.5
        self.wq_flat = (self.wq * inv_temper).transpose(1, 0, 2).reshape(
            num_units, num_heads * query_dim)
        self.wk_flat = self.wk.transpose(1, 0, 2).reshape(num_units, num_heads * key_dim)
        self.wv_flat = self.wv.transpose(1, 0, 2).reshape(num_units, num_heads * value_dim)
        self.proj_b2 = self.proj_b.reshape(1, num_units)
        self.ln_gamma2 = self.ln_gamma.reshape(1, num_units)
        self.ln_beta2 = self.ln_beta.reshape(1, num_units)

    def __call__(self, query, keys, values, return_attn=False, *,
                 batch_block=None, mxu_dtype=jnp.bfloat16,
                 attn_dtype=jnp.bfloat16):
        B, Lq, U = query.shape
        Lk = keys.shape[1]
        H, Dq, Dk, Dv = self.num_heads, self.query_dim, self.key_dim, self.value_dim

        if batch_block is None:
            batch_block = _pick_batch_block(B, Lq)
        assert B % batch_block == 0
        grid = (B // batch_block,)

        # MXU operand dtype: bf16 halves weight DMA/VMEM and doubles MXU rate on
        # v6e/v7x; accumulation (and all softmax/LN math) stays f32.
        wq = self.wq_flat.astype(mxu_dtype)
        wk = self.wk_flat.astype(mxu_dtype)
        wv = self.wv_flat.astype(mxu_dtype)
        pw = self.proj_w.astype(mxu_dtype)

        kernel = functools.partial(
            _mha_fused_kernel, num_heads=H, dq=Dq, dk=Dk, dv=Dv, eps=self.eps,
            write_attn=return_attn, mxu_dtype=mxu_dtype, attn_dtype=attn_dtype)

        in_specs = [
            pl.BlockSpec((batch_block, Lq, U), lambda b: (b, 0, 0)),  # query (+ residual)
            pl.BlockSpec((batch_block, Lk, U), lambda b: (b, 0, 0)),  # keys
            pl.BlockSpec((batch_block, Lk, U), lambda b: (b, 0, 0)),  # values
            pl.BlockSpec((U, H * Dq), lambda b: (0, 0)),              # Wq (pre-scaled)
            pl.BlockSpec((U, H * Dk), lambda b: (0, 0)),              # Wk
            pl.BlockSpec((U, H * Dv), lambda b: (0, 0)),              # Wv
            pl.BlockSpec((H * Dv, U), lambda b: (0, 0)),              # proj weight (flat)
            pl.BlockSpec((1, U), lambda b: (0, 0)),                   # proj bias
            pl.BlockSpec((1, U), lambda b: (0, 0)),                   # ln gamma
            pl.BlockSpec((1, U), lambda b: (0, 0)),                   # ln beta
        ]
        args = (query, keys, values, wq, wk, wv, pw,
                self.proj_b2, self.ln_gamma2, self.ln_beta2)

        if return_attn:
            out_shape = (
                jax.ShapeDtypeStruct((B, Lq, U), jnp.float32),
                jax.ShapeDtypeStruct((H, B, Lq, Lk), attn_dtype),     # head-major
            )
            out_specs = (
                pl.BlockSpec((batch_block, Lq, U), lambda b: (b, 0, 0)),
                pl.BlockSpec((H, batch_block, Lq, Lk), lambda b: (0, b, 0, 0)),
            )
        else:
            out_shape = jax.ShapeDtypeStruct((B, Lq, U), jnp.float32)
            out_specs = pl.BlockSpec((batch_block, Lq, U), lambda b: (b, 0, 0))

        result = pl.pallas_call(
            kernel,
            out_shape=out_shape,
            grid=grid,
            in_specs=in_specs,
            out_specs=out_specs,
            compiler_params=pltpu.CompilerParams(
                dimension_semantics=("parallel",)),
        )(*args)

        if return_attn:
            out, attn = result
            # (H, B, Lq, Lk) -> (H*B, Lq, Lk): head-major, pure reshape (no transpose).
            return out, attn.reshape(H * B, Lq, Lk)
        return result, None


# ----------------------------------------------------------------------------
# Pure-JAX reference for sanity checking
# ----------------------------------------------------------------------------
def reference_forward(mha, query, keys, values):
    H, U = mha.num_heads, mha.num_units

    def rl(x, w):
        B, L, _ = x.shape
        return jnp.einsum("blu,hud->hbld", x, w).reshape(H * B, L, w.shape[-1])

    Q, K, V = rl(query, mha.wq), rl(keys, mha.wk), rl(values, mha.wv)
    attn = jnp.einsum("bqd,bkd->bqk", Q, K) / (U ** 0.5)
    attn = jax.nn.softmax(attn, axis=-1)
    out = jnp.einsum("bqk,bkd->bqd", attn, V)
    B, Lq = query.shape[0], query.shape[1]
    out = out.reshape(H, B, Lq, -1).transpose(1, 2, 0, 3).reshape(B, Lq, -1)
    out = out @ mha.proj_w + mha.proj_b + query
    mean = out.mean(-1, keepdims=True)
    var = ((out - mean) ** 2).mean(-1, keepdims=True)
    out = (out - mean) / jnp.sqrt(var + mha.eps) * mha.ln_gamma + mha.ln_beta
    return out, attn


if __name__ == "__main__":
    key = jax.random.PRNGKey(0)
    k_param, k_q, k_k, k_v = jax.random.split(key, 4)

    # small shapes: batch=4, seq=8, num_units=32, heads=4, query/key/value dims=16
    B, L, U = 4, 8, 32
    H, Dq, Dk, Dv = 4, 16, 16, 16

    mha = MultiHeadAttentionPallas(H, U, Dq, Dk, Dv, k_param)

    query = jax.random.normal(k_q, (B, L, U), dtype=jnp.float32)
    keys = jax.random.normal(k_k, (B, L, U), dtype=jnp.float32)
    values = jax.random.normal(k_v, (B, L, U), dtype=jnp.float32)

    ref_out, ref_attn = reference_forward(mha, query, keys, values)

    # 1) Exact-precision configuration: f32 MXU operands, exact softmax, attn
    #    returned -> tight correctness check (semantics gate).
    out32, attn32 = mha(query, keys, values, return_attn=True,
                        mxu_dtype=jnp.float32, attn_dtype=jnp.float32)
    out32 = jax.block_until_ready(out32)
    attn32 = jax.block_until_ready(attn32)
    assert out32.shape == (B, L, U) and attn32.shape == (H * B, L, L)
    assert jnp.allclose(out32, ref_out, atol=2e-4, rtol=2e-4)
    assert jnp.allclose(attn32, ref_attn, atol=2e-5, rtol=2e-5)
    # Exact reciprocal for the returned probabilities -> rows sum to 1.
    assert jnp.allclose(attn32.sum(-1), 1.0, atol=1e-5)

    # 2) Performance configuration (defaults): bf16 MXU operands, f32 accumulation,
    #    approx-reciprocal softmax, attention NOT materialized.
    out_bf, attn_none = mha(query, keys, values)
    out_bf = jax.block_until_ready(out_bf)
    assert attn_none is None
    assert out_bf.shape == (B, L, U)
    assert bool(jnp.isfinite(out_bf).all())
    # bf16-operand-level agreement with the f32 reference.
    assert float(jnp.max(jnp.abs(out_bf - ref_out))) < 0.1

    print("KERNEL_OK")
</pallas_src>

<mosaic_0001>
module attributes {stable_mosaic.version = 11 : i64} {
  func.func @_mha_fused_kernel(%arg0: i32, %arg1: memref<2x8x32xf32, #tpu.memory_space<vmem>>, %arg2: memref<2x8x32xf32, #tpu.memory_space<vmem>>, %arg3: memref<2x8x32xf32, #tpu.memory_space<vmem>>, %arg4: memref<32x64xf32, #tpu.memory_space<vmem>>, %arg5: memref<32x64xf32, #tpu.memory_space<vmem>>, %arg6: memref<32x64xf32, #tpu.memory_space<vmem>>, %arg7: memref<64x32xf32, #tpu.memory_space<vmem>>, %arg8: memref<1x32xf32, #tpu.memory_space<vmem>>, %arg9: memref<1x32xf32, #tpu.memory_space<vmem>>, %arg10: memref<1x32xf32, #tpu.memory_space<vmem>>, %arg11: memref<2x8x32xf32, #tpu.memory_space<vmem>>, %arg12: memref<4x2x8x8xf32, #tpu.memory_space<vmem>>) attributes {dimension_semantics = [#tpu.dimension_semantics<parallel>], iteration_bounds = array<i64: 2>, scalar_prefetch = 0 : i64, scratch_operands = 0 : i64, tpu.core_type = #tpu.core_type<tc>, window_params = [{transform_indices = @transform_0, window_bounds = array<i64: 2, 8, 32>}, {transform_indices = @transform_1, window_bounds = array<i64: 2, 8, 32>}, {transform_indices = @transform_2, window_bounds = array<i64: 2, 8, 32>}, {pipeline_mode = #tpu.pipeline_mode<synchronous>, transform_indices = @transform_3, window_bounds = array<i64: 32, 64>}, {pipeline_mode = #tpu.pipeline_mode<synchronous>, transform_indices = @transform_4, window_bounds = array<i64: 32, 64>}, {pipeline_mode = #tpu.pipeline_mode<synchronous>, transform_indices = @transform_5, window_bounds = array<i64: 32, 64>}, {pipeline_mode = #tpu.pipeline_mode<synchronous>, transform_indices = @transform_6, window_bounds = array<i64: 64, 32>}, {pipeline_mode = #tpu.pipeline_mode<synchronous>, transform_indices = @transform_7, window_bounds = array<i64: 1, 32>}, {pipeline_mode = #tpu.pipeline_mode<synchronous>, transform_indices = @transform_8, window_bounds = array<i64: 1, 32>}, {pipeline_mode = #tpu.pipeline_mode<synchronous>, transform_indices = @transform_9, window_bounds = array<i64: 1, 32>}, {transform_indices = @transform_10, window_bounds = array<i64: 2, 8, 32>}, {transform_indices = @transform_11, window_bounds = array<i64: 4, 2, 8, 8>}]} {
    %c0 = arith.constant 0 : index
    %c0_0 = arith.constant 0 : index
    %c0_1 = arith.constant 0 : index
    %0 = vector.load %arg1[%c0, %c0_0, %c0_1] : memref<2x8x32xf32, #tpu.memory_space<vmem>>, vector<2x8x32xf32>
    %1 = vector.shape_cast %0 : vector<2x8x32xf32> to vector<16x32xf32>
    %c0_2 = arith.constant 0 : index
    %c0_3 = arith.constant 0 : index
    %c0_4 = arith.constant 0 : index
    %2 = vector.load %arg2[%c0_2, %c0_3, %c0_4] : memref<2x8x32xf32, #tpu.memory_space<vmem>>, vector<2x8x32xf32>
    %3 = vector.shape_cast %2 : vector<2x8x32xf32> to vector<16x32xf32>
    %c0_5 = arith.constant 0 : index
    %c0_6 = arith.constant 0 : index
    %c0_7 = arith.constant 0 : index
    %4 = vector.load %arg3[%c0_5, %c0_6, %c0_7] : memref<2x8x32xf32, #tpu.memory_space<vmem>>, vector<2x8x32xf32>
    %5 = vector.shape_cast %4 : vector<2x8x32xf32> to vector<16x32xf32>
    %c0_8 = arith.constant 0 : index
    %c0_9 = arith.constant 0 : index
    %6 = vector.load %arg4[%c0_8, %c0_9] : memref<32x64xf32, #tpu.memory_space<vmem>>, vector<32x64xf32>
    %cst = arith.constant dense<0.000000e+00> : vector<16x64xf32>
    %7 = tpu.matmul %1, %6, %cst {dimension_numbers = #tpu.dot_dimension_numbers<[1], [0], [0], [1], [0, 0, 1, 1], [], []>} : vector<16x32xf32>, vector<32x64xf32>, vector<16x64xf32> -> vector<16x64xf32>
    %c0_10 = arith.constant 0 : index
    %c0_11 = arith.constant 0 : index
    %8 = vector.load %arg5[%c0_10, %c0_11] : memref<32x64xf32, #tpu.memory_space<vmem>>, vector<32x64xf32>
    %cst_12 = arith.constant dense<0.000000e+00> : vector<16x64xf32>
    %9 = tpu.matmul %3, %8, %cst_12 {dimension_numbers = #tpu.dot_dimension_numbers<[1], [0], [0], [1], [0, 0, 1, 1], [], []>} : vector<16x32xf32>, vector<32x64xf32>, vector<16x64xf32> -> vector<16x64xf32>
    %c0_13 = arith.constant 0 : index
    %c0_14 = arith.constant 0 : index
    %10 = vector.load %arg6[%c0_13, %c0_14] : memref<32x64xf32, #tpu.memory_space<vmem>>, vector<32x64xf32>
    %cst_15 = arith.constant dense<0.000000e+00> : vector<16x64xf32>
    %11 = tpu.matmul %5, %10, %cst_15 {dimension_numbers = #tpu.dot_dimension_numbers<[1], [0], [0], [1], [0, 0, 1, 1], [], []>} : vector<16x32xf32>, vector<32x64xf32>, vector<16x64xf32> -> vector<16x64xf32>
    %12 = vector.extract_strided_slice %7 {offsets = [0, 0], sizes = [8, 64], strides = [1, 1]} : vector<16x64xf32> to vector<8x64xf32>
    %13 = vector.extract_strided_slice %9 {offsets = [0, 0], sizes = [8, 64], strides = [1, 1]} : vector<16x64xf32> to vector<8x64xf32>
    %14 = vector.extract_strided_slice %11 {offsets = [0, 0], sizes = [8, 64], strides = [1, 1]} : vector<16x64xf32> to vector<8x64xf32>
    %15 = vector.extract_strided_slice %12 {offsets = [0, 0], sizes = [8, 16], strides = [1, 1]} : vector<8x64xf32> to vector<8x16xf32>
    %16 = vector.extract_strided_slice %13 {offsets = [0, 0], sizes = [8, 16], strides = [1, 1]} : vector<8x64xf32> to vector<8x16xf32>
    %17 = vector.extract_strided_slice %14 {offsets = [0, 0], sizes = [8, 16], strides = [1, 1]} : vector<8x64xf32> to vector<8x16xf32>
    %cst_16 = arith.constant dense<0.000000e+00> : vector<8x8xf32>
    %18 = tpu.matmul %15, %16, %cst_16 {dimension_numbers = #tpu.dot_dimension_numbers<[1], [1], [0], [0], [0, 0, 1, 0], [], []>} : vector<8x16xf32>, vector<8x16xf32>, vector<8x8xf32> -> vector<8x8xf32>
    %cst_17 = arith.constant dense<0xFF800000> : vector<8xf32>
    %19 = vector.multi_reduction <maximumf>, %18, %cst_17 [1] : vector<8x8xf32> to vector<8xf32>
    %20 = vector.shape_cast %19 : vector<8xf32> to vector<8x1xf32>
    %21 = vector.broadcast %20 : vector<8x1xf32> to vector<8x8xf32>
    %22 = arith.subf %18, %21 : vector<8x8xf32>
    %23 = math.exp %22 : vector<8x8xf32>
    %cst_18 = arith.constant dense<0.000000e+00> : vector<8xf32>
    %24 = vector.multi_reduction <add>, %23, %cst_18 [1] : vector<8x8xf32> to vector<8xf32>
    %25 = vector.shape_cast %24 : vector<8xf32> to vector<8x1xf32>
    %26 = vector.broadcast %25 : vector<8x1xf32> to vector<8x8xf32>
    %27 = arith.divf %23, %26 : vector<8x8xf32>
    %c0_19 = arith.constant 0 : index
    %c0_20 = arith.constant 0 : index
    %c0_21 = arith.constant 0 : index
    %c0_22 = arith.constant 0 : index
    %28 = vector.load %arg12[%c0_19, %c0_20, %c0_21, %c0_22] : memref<4x2x8x8xf32, #tpu.memory_space<vmem>>, vector<1x1x8x8xf32>
    %29 = vector.shape_cast %28 : vector<1x1x8x8xf32> to vector<8x8xf32>
    %30 = vector.shape_cast %27 : vector<8x8xf32> to vector<1x1x8x8xf32>
    tpu.vector_store %arg12[%c0_19, %c0_20, %c0_21, %c0_22], %30 {strides = array<i32>} : memref<4x2x8x8xf32, #tpu.memory_space<vmem>>, vector<1x1x8x8xf32>,
    %cst_23 = arith.constant dense<0.000000e+00> : vector<8x16xf32>
    %31 = tpu.matmul %27, %17, %cst_23 {dimension_numbers = #tpu.dot_dimension_numbers<[1], [0], [0], [1], [0, 0, 1, 1], [], []>} : vector<8x8xf32>, vector<8x16xf32>, vector<8x16xf32> -> vector<8x16xf32>
    %32 = vector.extract_strided_slice %12 {offsets = [0, 16], sizes = [8, 16], strides = [1, 1]} : vector<8x64xf32> to vector<8x16xf32>
    %33 = vector.extract_strided_slice %13 {offsets = [0, 16], sizes = [8, 16], strides = [1, 1]} : vector<8x64xf32> to vector<8x16xf32>
    %34 = vector.extract_strided_slice %14 {offsets = [0, 16], sizes = [8, 16], strides = [1, 1]} : vector<8x64xf32> to vector<8x16xf32>
    %cst_24 = arith.constant dense<0.000000e+00> : vector<8x8xf32>
    %35 = tpu.matmul %32, %33, %cst_24 {dimension_numbers = #tpu.dot_dimension_numbers<[1], [1], [0], [0], [0, 0, 1, 0], [], []>} : vector<8x16xf32>, vector<8x16xf32>, vector<8x8xf32> -> vector<8x8xf32>
    %cst_25 = arith.constant dense<0xFF800000> : vector<8xf32>
    %36 = vector.multi_reduction <maximumf>, %35, %cst_25 [1] : vector<8x8xf32> to vector<8xf32>
    %37 = vector.shape_cast %36 : vector<8xf32> to vector<8x1xf32>
    %38 = vector.broadcast %37 : vector<8x1xf32> to vector<8x8xf32>
    %39 = arith.subf %35, %38 : vector<8x8xf32>
    %40 = math.exp %39 : vector<8x8xf32>
    %cst_26 = arith.constant dense<0.000000e+00> : vector<8xf32>
    %41 = vector.multi_reduction <add>, %40, %cst_26 [1] : vector<8x8xf32> to vector<8xf32>
    %42 = vector.shape_cast %41 : vector<8xf32> to vector<8x1xf32>
    %43 = vector.broadcast %42 : vector<8x1xf32> to vector<8x8xf32>
    %44 = arith.divf %40, %43 : vector<8x8xf32>
    %c1 = arith.constant 1 : index
    %c0_27 = arith.constant 0 : index
    %c0_28 = arith.constant 0 : index
    %c0_29 = arith.constant 0 : index
    %45 = vector.load %arg12[%c1, %c0_27, %c0_28, %c0_29] : memref<4x2x8x8xf32, #tpu.memory_space<vmem>>, vector<1x1x8x8xf32>
    %46 = vector.shape_cast %45 : vector<1x1x8x8xf32> to vector<8x8xf32>
    %47 = vector.shape_cast %44 : vector<8x8xf32> to vector<1x1x8x8xf32>
    tpu.vector_store %arg12[%c1, %c0_27, %c0_28, %c0_29], %47 {strides = array<i32>} : memref<4x2x8x8xf32, #tpu.memory_space<vmem>>, vector<1x1x8x8xf32>,
    %cst_30 = arith.constant dense<0.000000e+00> : vector<8x16xf32>
    %48 = tpu.matmul %44, %34, %cst_30 {dimension_numbers = #tpu.dot_dimension_numbers<[1], [0], [0], [1], [0, 0, 1, 1], [], []>} : vector<8x8xf32>, vector<8x16xf32>, vector<8x16xf32> -> vector<8x16xf32>
    %49 = vector.extract_strided_slice %12 {offsets = [0, 32], sizes = [8, 16], strides = [1, 1]} : vector<8x64xf32> to vector<8x16xf32>
    %50 = vector.extract_strided_slice %13 {offsets = [0, 32], sizes = [8, 16], strides = [1, 1]} : vector<8x64xf32> to vector<8x16xf32>
    %51 = vector.extract_strided_slice %14 {offsets = [0, 32], sizes = [8, 16], strides = [1, 1]} : vector<8x64xf32> to vector<8x16xf32>
    %cst_31 = arith.constant dense<0.000000e+00> : vector<8x8xf32>
    %52 = tpu.matmul %49, %50, %cst_31 {dimension_numbers = #tpu.dot_dimension_numbers<[1], [1], [0], [0], [0, 0, 1, 0], [], []>} : vector<8x16xf32>, vector<8x16xf32>, vector<8x8xf32> -> vector<8x8xf32>
    %cst_32 = arith.constant dense<0xFF800000> : vector<8xf32>
    %53 = vector.multi_reduction <maximumf>, %52, %cst_32 [1] : vector<8x8xf32> to vector<8xf32>
    %54 = vector.shape_cast %53 : vector<8xf32> to vector<8x1xf32>
    %55 = vector.broadcast %54 : vector<8x1xf32> to vector<8x8xf32>
    %56 = arith.subf %52, %55 : vector<8x8xf32>
    %57 = math.exp %56 : vector<8x8xf32>
    %cst_33 = arith.constant dense<0.000000e+00> : vector<8xf32>
    %58 = vector.multi_reduction <add>, %57, %cst_33 [1] : vector<8x8xf32> to vector<8xf32>
    %59 = vector.shape_cast %58 : vector<8xf32> to vector<8x1xf32>
    %60 = vector.broadcast %59 : vector<8x1xf32> to vector<8x8xf32>
    %61 = arith.divf %57, %60 : vector<8x8xf32>
    %c2 = arith.constant 2 : index
    %c0_34 = arith.constant 0 : index
    %c0_35 = arith.constant 0 : index
    %c0_36 = arith.constant 0 : index
    %62 = vector.load %arg12[%c2, %c0_34, %c0_35, %c0_36] : memref<4x2x8x8xf32, #tpu.memory_space<vmem>>, vector<1x1x8x8xf32>
    %63 = vector.shape_cast %62 : vector<1x1x8x8xf32> to vector<8x8xf32>
    %64 = vector.shape_cast %61 : vector<8x8xf32> to vector<1x1x8x8xf32>
    tpu.vector_store %arg12[%c2, %c0_34, %c0_35, %c0_36], %64 {strides = array<i32>} : memref<4x2x8x8xf32, #tpu.memory_space<vmem>>, vector<1x1x8x8xf32>,
    %cst_37 = arith.constant dense<0.000000e+00> : vector<8x16xf32>
    %65 = tpu.matmul %61, %51, %cst_37 {dimension_numbers = #tpu.dot_dimension_numbers<[1], [0], [0], [1], [0, 0, 1, 1], [], []>} : vector<8x8xf32>, vector<8x16xf32>, vector<8x16xf32> -> vector<8x16xf32>
    %66 = vector.extract_strided_slice %12 {offsets = [0, 48], sizes = [8, 16], strides = [1, 1]} : vector<8x64xf32> to vector<8x16xf32>
    %67 = vector.extract_strided_slice %13 {offsets = [0, 48], sizes = [8, 16], strides = [1, 1]} : vector<8x64xf32> to vector<8x16xf32>
    %68 = vector.extract_strided_slice %14 {offsets = [0, 48], sizes = [8, 16], strides = [1, 1]} : vector<8x64xf32> to vector<8x16xf32>
    %cst_38 = arith.constant dense<0.000000e+00> : vector<8x8xf32>
    %69 = tpu.matmul %66, %67, %cst_38 {dimension_numbers = #tpu.dot_dimension_numbers<[1], [1], [0], [0], [0, 0, 1, 0], [], []>} : vector<8x16xf32>, vector<8x16xf32>, vector<8x8xf32> -> vector<8x8xf32>
    %cst_39 = arith.constant dense<0xFF800000> : vector<8xf32>
    %70 = vector.multi_reduction <maximumf>, %69, %cst_39 [1] : vector<8x8xf32> to vector<8xf32>
    %71 = vector.shape_cast %70 : vector<8xf32> to vector<8x1xf32>
    %72 = vector.broadcast %71 : vector<8x1xf32> to vector<8x8xf32>
    %73 = arith.subf %69, %72 : vector<8x8xf32>
    %74 = math.exp %73 : vector<8x8xf32>
    %cst_40 = arith.constant dense<0.000000e+00> : vector<8xf32>
    %75 = vector.multi_reduction <add>, %74, %cst_40 [1] : vector<8x8xf32> to vector<8xf32>
    %76 = vector.shape_cast %75 : vector<8xf32> to vector<8x1xf32>
    %77 = vector.broadcast %76 : vector<8x1xf32> to vector<8x8xf32>
    %78 = arith.divf %74, %77 : vector<8x8xf32>
    %c3 = arith.constant 3 : index
    %c0_41 = arith.constant 0 : index
    %c0_42 = arith.constant 0 : index
    %c0_43 = arith.constant 0 : index
    %79 = vector.load %arg12[%c3, %c0_41, %c0_42, %c0_43] : memref<4x2x8x8xf32, #tpu.memory_space<vmem>>, vector<1x1x8x8xf32>
    %80 = vector.shape_cast %79 : vector<1x1x8x8xf32> to vector<8x8xf32>
    %81 = vector.shape_cast %78 : vector<8x8xf32> to vector<1x1x8x8xf32>
    tpu.vector_store %arg12[%c3, %c0_41, %c0_42, %c0_43], %81 {strides = array<i32>} : memref<4x2x8x8xf32, #tpu.memory_space<vmem>>, vector<1x1x8x8xf32>,
    %cst_44 = arith.constant dense<0.000000e+00> : vector<8x16xf32>
    %82 = tpu.matmul %78, %68, %cst_44 {dimension_numbers = #tpu.dot_dimension_numbers<[1], [0], [0], [1], [0, 0, 1, 1], [], []>} : vector<8x8xf32>, vector<8x16xf32>, vector<8x16xf32> -> vector<8x16xf32>
    %83 = tpu.concatenate %31, %48, %65, %82 in 1 : vector<8x16xf32>, vector<8x16xf32>, vector<8x16xf32>, vector<8x16xf32> -> vector<8x64xf32>
    %84 = vector.extract_strided_slice %7 {offsets = [8, 0], sizes = [8, 64], strides = [1, 1]} : vector<16x64xf32> to vector<8x64xf32>
    %85 = vector.extract_strided_slice %9 {offsets = [8, 0], sizes = [8, 64], strides = [1, 1]} : vector<16x64xf32> to vector<8x64xf32>
    %86 = vector.extract_strided_slice %11 {offsets = [8, 0], sizes = [8, 64], strides = [1, 1]} : vector<16x64xf32> to vector<8x64xf32>
    %87 = vector.extract_strided_slice %84 {offsets = [0, 0], sizes = [8, 16], strides = [1, 1]} : vector<8x64xf32> to vector<8x16xf32>
    %88 = vector.extract_strided_slice %85 {offsets = [0, 0], sizes = [8, 16], strides = [1, 1]} : vector<8x64xf32> to vector<8x16xf32>
    %89 = vector.extract_strided_slice %86 {offsets = [0, 0], sizes = [8, 16], strides = [1, 1]} : vector<8x64xf32> to vector<8x16xf32>
    %cst_45 = arith.constant dense<0.000000e+00> : vector<8x8xf32>
    %90 = tpu.matmul %87, %88, %cst_45 {dimension_numbers = #tpu.dot_dimension_numbers<[1], [1], [0], [0], [0, 0, 1, 0], [], []>} : vector<8x16xf32>, vector<8x16xf32>, vector<8x8xf32> -> vector<8x8xf32>
    %cst_46 = arith.constant dense<0xFF800000> : vector<8xf32>
    %91 = vector.multi_reduction <maximumf>, %90, %cst_46 [1] : vector<8x8xf32> to vector<8xf32>
    %92 = vector.shape_cast %91 : vector<8xf32> to vector<8x1xf32>
    %93 = vector.broadcast %92 : vector<8x1xf32> to vector<8x8xf32>
    %94 = arith.subf %90, %93 : vector<8x8xf32>
    %95 = math.exp %94 : vector<8x8xf32>
    %cst_47 = arith.constant dense<0.000000e+00> : vector<8xf32>
    %96 = vector.multi_reduction <add>, %95, %cst_47 [1] : vector<8x8xf32> to vector<8xf32>
    %97 = vector.shape_cast %96 : vector<8xf32> to vector<8x1xf32>
    %98 = vector.broadcast %97 : vector<8x1xf32> to vector<8x8xf32>
    %99 = arith.divf %95, %98 : vector<8x8xf32>
    %c0_48 = arith.constant 0 : index
    %c1_49 = arith.constant 1 : index
    %c0_50 = arith.constant 0 : index
    %c0_51 = arith.constant 0 : index
    %100 = vector.load %arg12[%c0_48, %c1_49, %c0_50, %c0_51] : memref<4x2x8x8xf32, #tpu.memory_space<vmem>>, vector<1x1x8x8xf32>
    %101 = vector.shape_cast %100 : vector<1x1x8x8xf32> to vector<8x8xf32>
    %102 = vector.shape_cast %99 : vector<8x8xf32> to vector<1x1x8x8xf32>
    tpu.vector_store %arg12[%c0_48, %c1_49, %c0_50, %c0_51], %102 {strides = array<i32>} : memref<4x2x8x8xf32, #tpu.memory_space<vmem>>, vector<1x1x8x8xf32>,
    %cst_52 = arith.constant dense<0.000000e+00> : vector<8x16xf32>
    %103 = tpu.matmul %99, %89, %cst_52 {dimension_numbers = #tpu.dot_dimension_numbers<[1], [0], [0], [1], [0, 0, 1, 1], [], []>} : vector<8x8xf32>, vector<8x16xf32>, vector<8x16xf32> -> vector<8x16xf32>
    %104 = vector.extract_strided_slice %84 {offsets = [0, 16], sizes = [8, 16], strides = [1, 1]} : vector<8x64xf32> to vector<8x16xf32>
    %105 = vector.extract_strided_slice %85 {offsets = [0, 16], sizes = [8, 16], strides = [1, 1]} : vector<8x64xf32> to vector<8x16xf32>
    %106 = vector.extract_strided_slice %86 {offsets = [0, 16], sizes = [8, 16], strides = [1, 1]} : vector<8x64xf32> to vector<8x16xf32>
    %cst_53 = arith.constant dense<0.000000e+00> : vector<8x8xf32>
    %107 = tpu.matmul %104, %105, %cst_53 {dimension_numbers = #tpu.dot_dimension_numbers<[1], [1], [0], [0], [0, 0, 1, 0], [], []>} : vector<8x16xf32>, vector<8x16xf32>, vector<8x8xf32> -> vector<8x8xf32>
    %cst_54 = arith.constant dense<0xFF800000> : vector<8xf32>
    %108 = vector.multi_reduction <maximumf>, %107, %cst_54 [1] : vector<8x8xf32> to vector<8xf32>
    %109 = vector.shape_cast %108 : vector<8xf32> to vector<8x1xf32>
    %110 = vector.broadcast %109 : vector<8x1xf32> to vector<8x8xf32>
    %111 = arith.subf %107, %110 : vector<8x8xf32>
    %112 = math.exp %111 : vector<8x8xf32>
    %cst_55 = arith.constant dense<0.000000e+00> : vector<8xf32>
    %113 = vector.multi_reduction <add>, %112, %cst_55 [1] : vector<8x8xf32> to vector<8xf32>
    %114 = vector.shape_cast %113 : vector<8xf32> to vector<8x1xf32>
    %115 = vector.broadcast %114 : vector<8x1xf32> to vector<8x8xf32>
    %116 = arith.divf %112, %115 : vector<8x8xf32>
    %c1_56 = arith.constant 1 : index
    %c1_57 = arith.constant 1 : index
    %c0_58 = arith.constant 0 : index
    %c0_59 = arith.constant 0 : index
    %117 = vector.load %arg12[%c1_56, %c1_57, %c0_58, %c0_59] : memref<4x2x8x8xf32, #tpu.memory_space<vmem>>, vector<1x1x8x8xf32>
    %118 = vector.shape_cast %117 : vector<1x1x8x8xf32> to vector<8x8xf32>
    %119 = vector.shape_cast %116 : vector<8x8xf32> to vector<1x1x8x8xf32>
    tpu.vector_store %arg12[%c1_56, %c1_57, %c0_58, %c0_59], %119 {strides = array<i32>} : memref<4x2x8x8xf32, #tpu.memory_space<vmem>>, vector<1x1x8x8xf32>,
    %cst_60 = arith.constant dense<0.000000e+00> : vector<8x16xf32>
    %120 = tpu.matmul %116, %106, %cst_60 {dimension_numbers = #tpu.dot_dimension_numbers<[1], [0], [0], [1], [0, 0, 1, 1], [], []>} : vector<8x8xf32>, vector<8x16xf32>, vector<8x16xf32> -> vector<8x16xf32>
    %121 = vector.extract_strided_slice %84 {offsets = [0, 32], sizes = [8, 16], strides = [1, 1]} : vector<8x64xf32> to vector<8x16xf32>
    %122 = vector.extract_strided_slice %85 {offsets = [0, 32], sizes = [8, 16], strides = [1, 1]} : vector<8x64xf32> to vector<8x16xf32>
    %123 = vector.extract_strided_slice %86 {offsets = [0, 32], sizes = [8, 16], strides = [1, 1]} : vector<8x64xf32> to vector<8x16xf32>
    %cst_61 = arith.constant dense<0.000000e+00> : vector<8x8xf32>
    %124 = tpu.matmul %121, %122, %cst_61 {dimension_numbers = #tpu.dot_dimension_numbers<[1], [1], [0], [0], [0, 0, 1, 0], [], []>} : vector<8x16xf32>, vector<8x16xf32>, vector<8x8xf32> -> vector<8x8xf32>
    %cst_62 = arith.constant dense<0xFF800000> : vector<8xf32>
    %125 = vector.multi_reduction <maximumf>, %124, %cst_62 [1] : vector<8x8xf32> to vector<8xf32>
    %126 = vector.shape_cast %125 : vector<8xf32> to vector<8x1xf32>
    %127 = vector.broadcast %126 : vector<8x1xf32> to vector<8x8xf32>
    %128 = arith.subf %124, %127 : vector<8x8xf32>
    %129 = math.exp %128 : vector<8x8xf32>
    %cst_63 = arith.constant dense<0.000000e+00> : vector<8xf32>
    %130 = vector.multi_reduction <add>, %129, %cst_63 [1] : vector<8x8xf32> to vector<8xf32>
    %131 = vector.shape_cast %130 : vector<8xf32> to vector<8x1xf32>
    %132 = vector.broadcast %131 : vector<8x1xf32> to vector<8x8xf32>
    %133 = arith.divf %129, %132 : vector<8x8xf32>
    %c2_64 = arith.constant 2 : index
    %c1_65 = arith.constant 1 : index
    %c0_66 = arith.constant 0 : index
    %c0_67 = arith.constant 0 : index
    %134 = vector.load %arg12[%c2_64, %c1_65, %c0_66, %c0_67] : memref<4x2x8x8xf32, #tpu.memory_space<vmem>>, vector<1x1x8x8xf32>
    %135 = vector.shape_cast %134 : vector<1x1x8x8xf32> to vector<8x8xf32>
    %136 = vector.shape_cast %133 : vector<8x8xf32> to vector<1x1x8x8xf32>
    tpu.vector_store %arg12[%c2_64, %c1_65, %c0_66, %c0_67], %136 {strides = array<i32>} : memref<4x2x8x8xf32, #tpu.memory_space<vmem>>, vector<1x1x8x8xf32>,
    %cst_68 = arith.constant dense<0.000000e+00> : vector<8x16xf32>
    %137 = tpu.matmul %133, %123, %cst_68 {dimension_numbers = #tpu.dot_dimension_numbers<[1], [0], [0], [1], [0, 0, 1, 1], [], []>} : vector<8x8xf32>, vector<8x16xf32>, vector<8x16xf32> -> vector<8x16xf32>
    %138 = vector.extract_strided_slice %84 {offsets = [0, 48], sizes = [8, 16], strides = [1, 1]} : vector<8x64xf32> to vector<8x16xf32>
    %139 = vector.extract_strided_slice %85 {offsets = [0, 48], sizes = [8, 16], strides = [1, 1]} : vector<8x64xf32> to vector<8x16xf32>
    %140 = vector.extract_strided_slice %86 {offsets = [0, 48], sizes = [8, 16], strides = [1, 1]} : vector<8x64xf32> to vector<8x16xf32>
    %cst_69 = arith.constant dense<0.000000e+00> : vector<8x8xf32>
    %141 = tpu.matmul %138, %139, %cst_69 {dimension_numbers = #tpu.dot_dimension_numbers<[1], [1], [0], [0], [0, 0, 1, 0], [], []>} : vector<8x16xf32>, vector<8x16xf32>, vector<8x8xf32> -> vector<8x8xf32>
    %cst_70 = arith.constant dense<0xFF800000> : vector<8xf32>
    %142 = vector.multi_reduction <maximumf>, %141, %cst_70 [1] : vector<8x8xf32> to vector<8xf32>
    %143 = vector.shape_cast %142 : vector<8xf32> to vector<8x1xf32>
    %144 = vector.broadcast %143 : vector<8x1xf32> to vector<8x8xf32>
    %145 = arith.subf %141, %144 : vector<8x8xf32>
    %146 = math.exp %145 : vector<8x8xf32>
    %cst_71 = arith.constant dense<0.000000e+00> : vector<8xf32>
    %147 = vector.multi_reduction <add>, %146, %cst_71 [1] : vector<8x8xf32> to vector<8xf32>
    %148 = vector.shape_cast %147 : vector<8xf32> to vector<8x1xf32>
    %149 = vector.broadcast %148 : vector<8x1xf32> to vector<8x8xf32>
    %150 = arith.divf %146, %149 : vector<8x8xf32>
    %c3_72 = arith.constant 3 : index
    %c1_73 = arith.constant 1 : index
    %c0_74 = arith.constant 0 : index
    %c0_75 = arith.constant 0 : index
    %151 = vector.load %arg12[%c3_72, %c1_73, %c0_74, %c0_75] : memref<4x2x8x8xf32, #tpu.memory_space<vmem>>, vector<1x1x8x8xf32>
    %152 = vector.shape_cast %151 : vector<1x1x8x8xf32> to vector<8x8xf32>
    %153 = vector.shape_cast %150 : vector<8x8xf32> to vector<1x1x8x8xf32>
    tpu.vector_store %arg12[%c3_72, %c1_73, %c0_74, %c0_75], %153 {strides = array<i32>} : memref<4x2x8x8xf32, #tpu.memory_space<vmem>>, vector<1x1x8x8xf32>,
    %cst_76 = arith.constant dense<0.000000e+00> : vector<8x16xf32>
    %154 = tpu.matmul %150, %140, %cst_76 {dimension_numbers = #tpu.dot_dimension_numbers<[1], [0], [0], [1], [0, 0, 1, 1], [], []>} : vector<8x8xf32>, vector<8x16xf32>, vector<8x16xf32> -> vector<8x16xf32>
    %155 = tpu.concatenate %103, %120, %137, %154 in 1 : vector<8x16xf32>, vector<8x16xf32>, vector<8x16xf32>, vector<8x16xf32> -> vector<8x64xf32>
    %156 = tpu.concatenate %83, %155 in 0 : vector<8x64xf32>, vector<8x64xf32> -> vector<16x64xf32>
    %c0_77 = arith.constant 0 : index
    %c0_78 = arith.constant 0 : index
    %157 = vector.load %arg7[%c0_77, %c0_78] : memref<64x32xf32, #tpu.memory_space<vmem>>, vector<64x32xf32>
    %cst_79 = arith.constant dense<0.000000e+00> : vector<16x32xf32>
    %158 = tpu.matmul %156, %157, %cst_79 {dimension_numbers = #tpu.dot_dimension_numbers<[1], [0], [0], [1], [0, 0, 1, 1], [], []>} : vector<16x64xf32>, vector<64x32xf32>, vector<16x32xf32> -> vector<16x32xf32>
    %c0_80 = arith.constant 0 : index
    %c0_81 = arith.constant 0 : index
    %159 = vector.load %arg8[%c0_80, %c0_81] : memref<1x32xf32, #tpu.memory_space<vmem>>, vector<1x32xf32>
    %160 = vector.broadcast %159 : vector<1x32xf32> to vector<16x32xf32>
    %161 = arith.addf %158, %160 : vector<16x32xf32>
    %162 = arith.addf %161, %1 : vector<16x32xf32>
    %cst_82 = arith.constant dense<0.000000e+00> : vector<16xf32>
    %163 = vector.multi_reduction <add>, %162, %cst_82 [1] : vector<16x32xf32> to vector<16xf32>
    %164 = vector.shape_cast %163 : vector<16xf32> to vector<16x1xf32>
    %cst_83 = arith.constant 3.200000e+01 : f32
    %165 = vector.broadcast %cst_83 : f32 to vector<16x1xf32>
    %166 = arith.divf %164, %165 : vector<16x1xf32>
    %167 = arith.mulf %162, %162 : vector<16x32xf32>
    %cst_84 = arith.constant dense<0.000000e+00> : vector<16xf32>
    %168 = vector.multi_reduction <add>, %167, %cst_84 [1] : vector<16x32xf32> to vector<16xf32>
    %169 = vector.shape_cast %168 : vector<16xf32> to vector<16x1xf32>
    %cst_85 = arith.constant 3.200000e+01 : f32
    %170 = vector.broadcast %cst_85 : f32 to vector<16x1xf32>
    %171 = arith.divf %169, %170 : vector<16x1xf32>
    %172 = arith.mulf %166, %166 : vector<16x1xf32>
    %173 = arith.subf %171, %172 : vector<16x1xf32>
    %174 = vector.broadcast %166 : vector<16x1xf32> to vector<16x32xf32>
    %175 = arith.subf %162, %174 : vector<16x32xf32>
    %cst_86 = arith.constant 9.99999997E-7 : f32
    %176 = vector.broadcast %cst_86 : f32 to vector<16x1xf32>
    %177 = arith.addf %173, %176 : vector<16x1xf32>
    %178 = math.rsqrt %177 : vector<16x1xf32>
    %179 = vector.broadcast %178 : vector<16x1xf32> to vector<16x32xf32>
    %180 = arith.mulf %175, %179 : vector<16x32xf32>
    %c0_87 = arith.constant 0 : index
    %c0_88 = arith.constant 0 : index
    %181 = vector.load %arg9[%c0_87, %c0_88] : memref<1x32xf32, #tpu.memory_space<vmem>>, vector<1x32xf32>
    %182 = vector.broadcast %181 : vector<1x32xf32> to vector<16x32xf32>
    %183 = arith.mulf %180, %182 : vector<16x32xf32>
    %c0_89 = arith.constant 0 : index
    %c0_90 = arith.constant 0 : index
    %184 = vector.load %arg10[%c0_89, %c0_90] : memref<1x32xf32, #tpu.memory_space<vmem>>, vector<1x32xf32>
    %185 = vector.broadcast %184 : vector<1x32xf32> to vector<16x32xf32>
    %186 = arith.addf %183, %185 : vector<16x32xf32>
    %187 = vector.shape_cast %186 : vector<16x32xf32> to vector<2x8x32xf32>
    %c0_91 = arith.constant 0 : index
    %c0_92 = arith.constant 0 : index
    %c0_93 = arith.constant 0 : index
    %188 = vector.load %arg11[%c0_91, %c0_92, %c0_93] : memref<2x8x32xf32, #tpu.memory_space<vmem>>, vector<2x8x32xf32>
    tpu.vector_store %arg11[%c0_91, %c0_92, %c0_93], %187 {strides = array<i32>} : memref<2x8x32xf32, #tpu.memory_space<vmem>>, vector<2x8x32xf32>,
    return
  }
  func.func @transform_0(%arg0: i32) -> (i32, i32, i32) {
    %c0_i32 = arith.constant 0 : i32
    %c0_i32_0 = arith.constant 0 : i32
    %c0_i32_1 = arith.constant 0 : i32
    return %arg0, %c0_i32, %c0_i32_0 : i32, i32, i32
  }
  func.func @transform_1(%arg0: i32) -> (i32, i32, i32) {
    %c0_i32 = arith.constant 0 : i32
    %c0_i32_0 = arith.constant 0 : i32
    %c0_i32_1 = arith.constant 0 : i32
    return %arg0, %c0_i32, %c0_i32_0 : i32, i32, i32
  }
  func.func @transform_2(%arg0: i32) -> (i32, i32, i32) {
    %c0_i32 = arith.constant 0 : i32
    %c0_i32_0 = arith.constant 0 : i32
    %c0_i32_1 = arith.constant 0 : i32
    return %arg0, %c0_i32, %c0_i32_0 : i32, i32, i32
  }
  func.func @transform_3(%arg0: i32) -> (i32, i32) {
    %c0_i32 = arith.constant 0 : i32
    %c0_i32_0 = arith.constant 0 : i32
    %c0_i32_1 = arith.constant 0 : i32
    return %c0_i32, %c0_i32_0 : i32, i32
  }
  func.func @transform_4(%arg0: i32) -> (i32, i32) {
    %c0_i32 = arith.constant 0 : i32
    %c0_i32_0 = arith.constant 0 : i32
    %c0_i32_1 = arith.constant 0 : i32
    return %c0_i32, %c0_i32_0 : i32, i32
  }
  func.func @transform_5(%arg0: i32) -> (i32, i32) {
    %c0_i32 = arith.constant 0 : i32
    %c0_i32_0 = arith.constant 0 : i32
    %c0_i32_1 = arith.constant 0 : i32
    return %c0_i32, %c0_i32_0 : i32, i32
  }
  func.func @transform_6(%arg0: i32) -> (i32, i32) {
    %c0_i32 = arith.constant 0 : i32
    %c0_i32_0 = arith.constant 0 : i32
    %c0_i32_1 = arith.constant 0 : i32
    return %c0_i32, %c0_i32_0 : i32, i32
  }
  func.func @transform_7(%arg0: i32) -> (i32, i32) {
    %c0_i32 = arith.constant 0 : i32
    %c0_i32_0 = arith.constant 0 : i32
    %c0_i32_1 = arith.constant 0 : i32
    return %c0_i32, %c0_i32_0 : i32, i32
  }
  func.func @transform_8(%arg0: i32) -> (i32, i32) {
    %c0_i32 = arith.constant 0 : i32
    %c0_i32_0 = arith.constant 0 : i32
    %c0_i32_1 = arith.constant 0 : i32
    return %c0_i32, %c0_i32_0 : i32, i32
  }
  func.func @transform_9(%arg0: i32) -> (i32, i32) {
    %c0_i32 = arith.constant 0 : i32
    %c0_i32_0 = arith.constant 0 : i32
    %c0_i32_1 = arith.constant 0 : i32
    return %c0_i32, %c0_i32_0 : i32, i32
  }
  func.func @transform_10(%arg0: i32) -> (i32, i32, i32) {
    %c0_i32 = arith.constant 0 : i32
    %c0_i32_0 = arith.constant 0 : i32
    %c0_i32_1 = arith.constant 0 : i32
    return %arg0, %c0_i32, %c0_i32_0 : i32, i32, i32
  }
  func.func @transform_11(%arg0: i32) -> (i32, i32, i32, i32) {
    %c0_i32 = arith.constant 0 : i32
    %c0_i32_0 = arith.constant 0 : i32
    %c0_i32_1 = arith.constant 0 : i32
    %c0_i32_2 = arith.constant 0 : i32
    return %c0_i32, %arg0, %c0_i32_0, %c0_i32_1 : i32, i32, i32, i32
  }
}

</mosaic_0001>

<bundles_post_ra>
// kernel: tpu_custom_call.1
= control target key start
LH: loop header
LB: loop body
LE: loop exit
PB: predicated region body
PF: predicated region fallthrough
CT: control target
= control target key end

     0   :  { %s3624_s0 = inlined_call_operand.vmem [shape: f32[4,8,32], index: 0, kind: input, shape index: {}]   ;;  %s3625_s1 = inlined_call_operand.vmem [shape: f32[4,8,32], index: 1, kind: input, shape index: {}]   ;;  %s3626_s2 = inlined_call_operand.vmem [shape: f32[4,8,32], index: 2, kind: input, shape index: {}]   ;;  %s3627_s3 = inlined_call_operand.hbm [shape: f32[32,64], index: 3, kind: input, shape index: {}]   ;;  %s3628_s4 = inlined_call_operand.hbm [shape: f32[32,64], index: 4, kind: input, shape index: {}]   ;;  %s3629_s5 = inlined_call_operand.hbm [shape: f32[32,64], index: 5, kind: input, shape index: {}]   ;;  %s3630_s6 = inlined_call_operand.vmem [shape: f32[64,32], index: 6, kind: input, shape index: {}]   ;;  %s3631_s7 = inlined_call_operand.vmem [shape: f32[1,32], index: 7, kind: input, shape index: {}]   ;;  %s3632_s8 = inlined_call_operand.vmem [shape: f32[1,32], index: 8, kind: input, shape index: {}]   ;;  %s3633_s9 = inlined_call_operand.vmem [shape: f32[1,32], index: 9, kind: input, shape index: {}]   ;;  %s3634_s10 = inlined_call_operand.hbm [shape: f32[4,8,32], index: 10, kind: output, shape index: {0}]   ;;  %s3635_s11 = inlined_call_operand.hbm [shape: f32[4,4,8,8], index: 11, kind: output, shape index: {1}]  }
   0x1   :  { %3645 = sst [smem:[#allocation23_spill]] %s3635_s11 }
   0x2   :  { %17 = vsyncpa [#allocation3], 0 }
   0x3   :  { %18 = vsyncpa [#allocation6], 0 }
   0x4   :  { %19 = vsyncpa [#allocation4], 0 }
   0x5   :  { %21 = vsyncpa [#allocation4 + $0x1], 0 }
   0x6   :  { %22 = vsyncpa [#allocation10], 0 }
   0x7   :  { %24 = vsyncpa [#allocation10 + $0x1], 0  ;;  %s3154_s17 = smov 0   ;;  %s3156_s18 = smov 0  }
   0x8   :  { %s3158_s19 = smov 0   ;;  %s3160_s20 = smov 0  }
   0x9 LB: > { %3646 = sst [smem:[#allocation17_spill]] %s3057_s17  ;;  %s3175_s21 = sadd.s32 4294967295, %s3069_s20   ;;  %s3069_s20 = sphi %s3160_s20, %s3668_s20   ;;  %s3065_s19 = sphi %s3158_s19, %s3670_s19   ;;  %s3061_s18 = sphi %s3156_s18, %s3672_s18   ;;  %s3057_s17 = sphi %s3154_s17, %s3671_s17  }
   0xa   : > { %3647 = sst [smem:[#allocation18_spill]] %s3065_s19  ;;  %s2473_s22 = sadd.s32 4294967294, %s3069_s20  }
   0xb   : > { %3648 = sst [smem:[#allocation19_spill]] %s3069_s20  ;;  %s3179_s23 = sadd.s32 1, %s3069_s20  }
   0xc   : > { %3649 = sst [smem:[#allocation20_spill]] %s3179_s23  ;;  %s262_s24 = sadd.s32 1, %s3065_s19 }
   0xd   : > { %s259_s25 = ssub.s32 %s3069_s20, %s3179_s23  ;;  %p272_p0 = scmp.ne.s32.totalorder %s3065_s19, %s3061_s18 }
   0xe   : > { %p260_p1 = scmp.eq.s32.totalorder %s259_s25, 0  ;;  %p273_p2 = scmp.eq.s32.totalorder %s3175_s21, 1 }
   0xf   : > { %p278_p3 = scmp.ne.s32.totalorder %s3061_s18, %s3057_s17  ;;  %p279_p4 = scmp.eq.s32.totalorder %s2473_s22, 1 }
  0x10   : > { %s3190_s26 = scalar_select %p260_p1, %s3065_s19, %s262_s24  }
  0x11   : > { %p3192_p5 = por %p273_p2, %p272_p0  ;;  %p3196_p6 = por %p279_p4, %p278_p3 }
  0x12   : > { %3650 = sst [smem:[#allocation21_spill]] %s3190_s26  ;;  %p2474_p7 = scmp.ge.s32.totalorder %s3069_s20, 1 }
  0x13   : > { %s3651_s27 = scalar_select %p3192_p5, 1, 0 }
  0x14   : > { %s3652_s28 = scalar_select %p3196_p6, 1, 0 }
  0x15   : > { %p312_p8 = scmp.lt.s32.totalorder %s3069_s20, 3  ;;  %p3639_p9 = scmp.eq.s32.totalorder %s3175_s21, 0 }
  0x16   : > { %3653 = sst [smem:[#allocation22_spill]] %s3652_s28  ;;  %s3071_s30 = smov [#allocation5]  }
  0x17   : > { %p3203_p10 = pnand %p2474_p7, %p312_p8  ;;  %s337_s12 = sshll.u32 %s3071_s30, 4  ;;  %s3209_s12 = int_to_ptr.vmem [resolvable:$true] %s337_s12 }
  0x18   : > { %s3072_s14 = smov [#allocation2]   ;;  %s3073_s16 = smov [#allocation7]  }
  0x19   : > { %s3654_s29 = scalar_select %p3203_p10, 1, 0 }
  0x1a   : > { %p2797_p11 = pneg %p3203_p10  ;;  %s324_s15 = sshll.u32 %s3072_s14, 4  ;;  %s3217_s15 = int_to_ptr.vmem [resolvable:$true] %s324_s15 }
  0x1b   : > { %s3219_s22 = sshll.u32 %s3073_s16, 4  ;;  %s2911_s26 = scalar_lea.hbm %s3628_s4, 512  ;;  %s351_s22 = int_to_ptr.vmem [resolvable:$true] %s3219_s22 }
  0x1c   : > { %p3213_p12 = pnand %p3639_p9, %p2797_p11  ;;  %p2912_p13 = scmp.ne.s32.totalorder %s3628_s4, %s2911_s26 }
  0x1d   : > { %p2918_p3 = scmp.lt.u32.totalorder %s2911_s26, %s3628_s4 }
  0x1e   : > { %p3229_p0 = pneg %p3213_p12 }
  0x20   : > { %p2914_p1 = pnand %p3229_p0, %p2912_p13 }
  0x22   : > { %p2915_p2 = pneg %p2914_p1 }
  0x24   : > { %p2920_p4 = pnand %p2918_p3, %p2915_p2 }
  0x26   : > { %2923 = shalt.err (!%p2920_p4)
}
  0x27   : > { %s2924_s19 = scalar_lea.vmem %s3209_s12, 512  ;;  %p2932_p9 = scmp.lt.s32.totalorder %s3209_s12, %s3209_s12 }
  0x28   : > { %p2925_p7 = scmp.ne.s32.totalorder %s3209_s12, %s2924_s19  ;;  %p2933_p6 = scmp.lt.s32.totalorder %s2924_s19, %s2924_s19 }
  0x2a   : > { %p2927_p8 = pnand %p2925_p7, %p3229_p0  ;;  %p2934_p13 = por %p2933_p6, %p2932_p9 }
  0x2c   : > { %p2928_p11 = pneg %p2927_p8 }
  0x2e   : > { %p2935_p1 = pnand %p2934_p13, %p2928_p11 }
  0x30   : > { %2938 = shalt.err (!%p2935_p1)
}
  0x31   : > { %s3074_s24 = smov 128   ;;  %s3075_s26 = smov 8  }
  0x32   : > { %2803 = dma.hbm_to_vmem [thread:$0]  (!%p3213_p12), %s3628_s4, 512, %s3209_s12, [#allocation6], %s3074_s24, %s3074_s24, %s3075_s26  }
  0x33   : > { %s2939_s19 = scalar_lea.hbm %s3627_s3, 512 }
  0x34   : > { %p2940_p6 = scmp.ne.s32.totalorder %s3627_s3, %s2939_s19  ;;  %p2946_p3 = scmp.lt.u32.totalorder %s2939_s19, %s3627_s3 }
  0x36   : > { %p2942_p9 = pnand %p2940_p6, %p3229_p0 }
  0x38   : > { %p2943_p2 = pneg %p2942_p9 }
  0x3a   : > { %p2948_p4 = pnand %p2946_p3, %p2943_p2 }
  0x3c   : > { %2951 = shalt.err (!%p2948_p4)
}
  0x3d   : > { %s2952_s12 = scalar_lea.vmem %s3217_s15, 512  ;;  %p2960_p13 = scmp.lt.s32.totalorder %s3217_s15, %s3217_s15 }
  0x3e   : > { %p2953_p7 = scmp.ne.s32.totalorder %s3217_s15, %s2952_s12  ;;  %p2961_p1 = scmp.lt.s32.totalorder %s2952_s12, %s2952_s12 }
  0x40   : > { %p2955_p8 = pnand %p2953_p7, %p3229_p0  ;;  %p2962_p6 = por %p2961_p1, %p2960_p13 }
  0x42   : > { %p2956_p11 = pneg %p2955_p8 }
  0x44   : > { %p2963_p9 = pnand %p2962_p6, %p2956_p11 }
  0x46   : > { %2966 = shalt.err (!%p2963_p9)
}
  0x47   : > { %2800 = dma.hbm_to_vmem [thread:$0]  (!%p3213_p12), %s3627_s3, 512, %s3217_s15, [#allocation3], %s3074_s24, %s3074_s24, %s3075_s26  }
  0x48   : > { %s2967_s25 = scalar_lea.hbm %s3629_s5, 512 }
  0x49   : > { %p2968_p2 = scmp.ne.s32.totalorder %s3629_s5, %s2967_s25  ;;  %p2974_p7 = scmp.lt.u32.totalorder %s2967_s25, %s3629_s5 }
  0x4b   : > { %p2970_p3 = pnand %p2968_p2, %p3229_p0 }
  0x4d   : > { %p2971_p4 = pneg %p2970_p3 }
  0x4f   : > { %p2976_p8 = pnand %p2974_p7, %p2971_p4 }
  0x51   : > { %2979 = shalt.err (!%p2976_p8)
}
  0x52   : > { %s2980_s12 = scalar_lea.vmem %s351_s22, 512  ;;  %p2988_p6 = scmp.lt.s32.totalorder %s351_s22, %s351_s22 }
  0x53   : > { %p2981_p11 = scmp.ne.s32.totalorder %s351_s22, %s2980_s12  ;;  %p2989_p9 = scmp.lt.s32.totalorder %s2980_s12, %s2980_s12 }
  0x55   : > { %p2983_p13 = pnand %p2981_p11, %p3229_p0  ;;  %p2990_p5 = por %p2989_p9, %p2988_p6 }
  0x57   : > { %p2984_p1 = pneg %p2983_p13 }
  0x59   : > { %p2991_p10 = pnand %p2990_p5, %p2984_p1 }
  0x5b   : > { %2994 = shalt.err (!%p2991_p10)
}
  0x5c   : > { %2806 = dma.hbm_to_vmem [thread:$0]  (!%p3213_p12), %s3629_s5, 512, %s351_s22, [#allocation6], %s3074_s24, %s3074_s24, %s3075_s26  }
  0x5d   : > { %p3657_p2 = scmp.ne.s32.totalorder %s3654_s29, 0 }
  0x5e   : > { %p3658_p0 = scmp.eq.s32.totalorder (!%p3657_p2), %s3175_s21, 0 }
  0x5f   : > { %405 = sbr.rel (%p3657_p2) target bundleno = 1797 (0x705), region = 60 }
  0x66   : > { %3040 = dma.done.wait (%p3658_p0), [#allocation3], 512   ;;  %p3659_p3 = pmov %p3658_p0 }
  0x67   : > { %p3660_p5 = pmov %p3658_p0 }
  0x68   : > { %3042 = vsyncadd (%p3659_p3), [#allocation3], 4294966784 }
  0x69   : > { %3044 = dma.done.wait (%p3660_p5), [#allocation6], 1024   ;;  %p3661_p10 = pmov %p3658_p0 }
  0x6a   : > { %s2485_s23 = sshll.u32 %s3175_s21, 1  ;;  %vm498_vm0 = vcmask 261120   ;;  %v494_v0 = vld [vmem:[#allocation2] sm:$0xff]  ;;  %v495_v1 = vld [vmem:[#allocation2 + $0x8] sm:$0xff]  ;;  %v496_v2 = vld [vmem:[#allocation2 + $0x10] sm:$0xff]  ;;  %v3076_v16 = vmov 0.0  }
  0x6b   : > { %3046 = vsyncadd (%p3661_p10), [#allocation6], 4294966272  ;;  %p469_p4 = scmp.lt.s32.totalorder %s2485_s23, 3  ;;  %v2735_v3 = vpack.c.bf16 %v495_v1, %v494_v0  ;;  %v497_v4 = vld [vmem:[#allocation2 + $0x18] sm:$0xff]  ;;  %v580_v7 = vld [vmem:[#allocation5] sm:$0xff]  ;;  %vm3077_vm1 = vmmov 0  }
  0x6c   : > { %v2739_v6 = vpack.c.bf16 %v497_v4, %v496_v2  ;;  %v581_v8 = vld [vmem:[#allocation5 + $0x8] sm:$0xff]  ;;  %v582_v10 = vld [vmem:[#allocation5 + $0x10] sm:$0xff]  ;;  %v583_v11 = vld [vmem:[#allocation5 + $0x18] sm:$0xff]  ;;  %vm750_vm2 = vcmask 130048   ;;  %s3078_s14 = smov 96   ;;  %s3079_s16 = smov 112  }
  0x6d   : > { %s3674_s23 = smov (!%p469_p4, %s2485_s23), 3  ;;  %2736 = vmatprep.subr.bf16.mxu1 %v2735_v3  ;;  %v2743_v9 = vpack.c.bf16 %v581_v8, %v580_v7  ;;  %v2747_v13 = vpack.c.bf16 %v583_v11, %v582_v10  ;;  %v665_v17 = vld [vmem:[#allocation7] sm:$0xff]  ;;  %v666_v18 = vld [vmem:[#allocation7 + $0x8] sm:$0xff]  ;;  %v667_v19 = vld [vmem:[#allocation7 + $0x10] sm:$0xff]  ;;  %s3080_s19 = smov 80   ;;  %vm827_vm3 = vcmask 64512  }
  0x6e   : > { %s3312_s13 = sshll.u32 %s3674_s23, 3  ;;  %2738 = vmatpush3.bf16.msra.mxu1 %v2735_v3  ;;  %v2751_v20 = vpack.c.bf16 %v666_v18, %v665_v17  ;;  %v668_v21 = vld [vmem:[#allocation7 + $0x18] sm:$0xff]  ;;  %s3411_s12 = sand.u32 1, %s3061_s18   ;;  %vm1429_vm4 = vcmask 392192   ;;  %vm2125_vm5 = vcmask 523264  }
  0x6f   : > { %s472_s24 = scalar_lea.vmem %s3624_s0, %s3312_s13  ;;  %2740 = vmatprep.subr.bf16.mxu1 %v2739_v6  ;;  %s478_s20 = scalar_lea.vmem %s3625_s1, %s3312_s13  ;;  %v2755_v23 = vpack.c.bf16 %v668_v21, %v667_v19 }
  0x70   : > { %v3318_v5 = vld [vmem:[%s472_s24] sm:$0xff]  ;;  %v3326_v12 = vld [vmem:[%s472_s24 + $0x8] sm:$0xff]  ;;  %s484_s30 = scalar_lea.vmem %s3626_s2, %s3312_s13  ;;  %2752 = vmatprep.subr.bf16.mxu0 %v2751_v20  ;;  %s2484_s15 = sshll.u32 %s3411_s12, 6 }
  0x71   : > { %2611 = vmatprep.mubr.msk.f32.mxu1 %vm498_vm0, %v3318_v5  ;;  %v490_v14 = vld [vmem:[%s478_s20] sm:$0xff]  ;;  %v491_v15 = vld [vmem:[%s478_s20 + $0x8] sm:$0xff]  ;;  %2754 = vmatpush3.bf16.msra.mxu0 %v2751_v20  ;;  %s3445_s11 = scalar_lea.vmem [#allocation9], %s2484_s15  ;;  %s3081_s23 = smov 16  }
  0x72   : > { %2742 = vmatpush3.bf16.msra.mxu1 %v2739_v6  ;;  %v492_v22 = vld [vmem:[%s484_s30] sm:$0xff]  ;;  %2756 = vmatprep.subr.bf16.mxu0 %v2755_v23  ;;  %v493_v24 = vld [vmem:[%s484_s30 + $0x8] sm:$0xff]  ;;  %s3082_s13 = smov 32   ;;  %s3083_s26 = smov 48  }
  0x73   : > { %2744 = vmatprep.subr.bf16.mxu1 %v2743_v9  ;;  %2633 = vmatprep.mubr.msk.f32.mxu0 %vm498_vm0, %v492_v22  ;;  %s2483_s28 = sshll.u32 %s3411_s12, 4  ;;  %s2261_s24 = scalar_lea.sflag [#allocation4], %s3411_s12 }
  0x74   : > { %p3662_p7 = scmp.ne.s32.totalorder %s3651_s27, 0 }
  0x75   : > { %2612 = vmatmul.mubr.msk.f32.vlgmr.msra.gmra.mrb[0].mxu1 %vm498_vm0, %v3326_v12  ;;  %2758 = vmatpush3.bf16.msra.mxu0 %v2755_v23 }
  0x76   : > { %2746 = vmatpush3.bf16.msra.mxu1 %v2743_v9  ;;  %2622 = vmatprep.mubr.msk.f32.mxu1 %vm498_vm0, %v490_v14 }
  0x77   : > { %2748 = vmatprep.subr.bf16.mxu1 %v2747_v13  ;;  %2646 = vmatprep.subr.mxu0 %v3076_v16 }
  0x78   : > { %2634 = vmatmul.mubr.msk.f32.vlgmr.msra.gmra.mrb[0].mxu0 %vm498_vm0, %v493_v24 }
  0x79   : > { %2648 = vmatprep.mubr.msk.f32.mxu0 %vm3077_vm1, %v3076_v16 }
  0x7a   : > { %2750 = vmatpush3.bf16.msra.mxu1 %v2747_v13 }
  0x7b   : > { %2636 = vmatprep.subr.mxu1 %v3076_v16 }
  0x7d   : > { %2623 = vmatmul.mubr.msk.f32.vlgmr.msra.gmra.mrb[2].mxu1 %vm498_vm0, %v491_v15 }
  0x7e   : > { %2638 = vmatprep.mubr.msk.f32.mxu1 %vm3077_vm1, %v3076_v16 }
 0x148   : > { %v2613_v25 = vpop.f32.mrb[0].mxu1 }
 0x149   : > { %v571_v26 = vpop.f32.mrb[1].mxu1 }
 0x14b   : > { %v3362_v31 = vpop.f32.mrb[0].mxu0 }
 0x14c   : > { %v3365_v32 = vpop.f32.mrb[1].mxu0 }
 0x150   : > { %v2624_v27 = vpop.f32.mrb[2].mxu1 }
 0x151   : > { %v656_v28 = vpop.f32.mrb[3].mxu1 }
 0x152   : > { %1083 = vrot.lane.b32.xlu1 %v656_v28, %s3078_s14  ;;  %915 = vrot.lane.b32.xlu0 %v656_v28, %s3079_s16 }
 0x153   : > { %2637 = vmatpush3.xpose.msk.msra.mxu1 %vm750_vm2, %v656_v28 }
 0x154   : > { %2641 = vmatprep.subr.mxu1 %v3076_v16 }
 0x156   : > { %2639 = vmatmul.mubr.msk.f32.vlgmr.msra.gmra.mrb[4].mxu1 %vm750_vm2, %v571_v26  ;;  %1081 = vrot.lane.b32.xlu1 %v571_v26, %s3078_s14 }
 0x157   : > { %913 = vrot.lane.b32.xlu0 %v571_v26, %s3079_s16  ;;  %2643 = vmatprep.mubr.msk.f32.mxu1 %vm3077_vm1, %v3076_v16 }
 0x158   : > { %2642 = vmatpush3.msra.mxu1 %v3365_v32 }
 0x159   : > { %2651 = vmatprep.subr.mxu1 %v3076_v16 }
 0x15a   : > { %1248 = vrot.lane.b32.xlu1 %v571_v26, %s3080_s19 }
 0x15b   : > { %1250 = vrot.lane.b32.xlu0 %v656_v28, %s3080_s19 }
 0x15e   : > { %1593 = vrot.lane.b32.xlu1 %v2613_v25, %s3079_s16 }
 0x15f   : > { %1595 = vrot.lane.b32.xlu0 %v2624_v27, %s3079_s16 }
 0x162   : > { %1761 = vrot.lane.b32.xlu1 %v2613_v25, %s3078_s14 }
 0x163   : > { %1763 = vrot.lane.b32.xlu0 %v2624_v27, %s3078_s14 }
 0x166   : > { %1928 = vrot.lane.b32.xlu1 %v2613_v25, %s3080_s19 }
 0x167   : > { %1930 = vrot.lane.b32.xlu0 %v2624_v27, %s3080_s19 }
 0x1c4   : > { %v1084_v29 = vpop.permute.xlu1 %1083  ;;  %v916_v30 = vpop.permute.xlu0 %915 }
 0x1c5   : > { %2647 = vmatpush3.xpose.msk.msra.mxu0 %vm750_vm2, %v916_v30 }
 0x1c6   : > { %2656 = vmatprep.subr.mxu0 %v3076_v16 }
 0x1c8   : > { %v1082_v33 = vpop.permute.xlu1 %1081 }
 0x1c9   : > { %v914_v34 = vpop.permute.xlu0 %913 }
 0x1ca   : > { %2649 = vmatmul.mubr.msk.f32.vlgmr.msra.gmra.mrb[2].mxu0 %vm750_vm2, %v914_v34 }
 0x1cb   : > { %2657 = vmatpush3.xpose.msk.msra.mxu0 %vm750_vm2, %v1084_v29  ;;  %2658 = vmatprep.mubr.msk.f32.mxu0 %vm3077_vm1, %v3076_v16 }
 0x1cc   : > { %2666 = vmatprep.subr.mxu0 %v3076_v16  ;;  %v1249_v36 = vpop.permute.xlu1 %1248 }
 0x1cd   : > { %v1251_v35 = vpop.permute.xlu0 %1250 }
 0x1ce   : > { %2659 = vmatmul.mubr.msk.f32.vlgmr.msra.gmra.mrb[4].mxu0 %vm750_vm2, %v1082_v33 }
 0x1cf   : > { %2667 = vmatpush3.xpose.msk.msra.mxu0 %vm750_vm2, %v1251_v35  ;;  %2668 = vmatprep.mubr.msk.f32.mxu0 %vm3077_vm1, %v3076_v16 }
 0x1d0   : > { %2676 = vmatprep.subr.mxu0 %v3076_v16  ;;  %v1594_v38 = vpop.permute.xlu1 %1593 }
 0x1d1   : > { %v1596_v37 = vpop.permute.xlu0 %1595 }
 0x1d2   : > { %2669 = vmatmul.mubr.msk.f32.vlgmr.msra.gmra.mrb[6].mxu0 %vm750_vm2, %v1249_v36 }
 0x1d3   : > { %2677 = vmatpush3.xpose.msk.msra.mxu0 %vm750_vm2, %v2624_v27  ;;  %2678 = vmatprep.mubr.msk.f32.mxu0 %vm3077_vm1, %v3076_v16 }
 0x1d4   : > { %2686 = vmatprep.subr.mxu0 %v3076_v16  ;;  %v1762_v40 = vpop.permute.xlu1 %1761 }
 0x1d5   : > { %v1764_v39 = vpop.permute.xlu0 %1763 }
 0x1d6   : > { %2679 = vmatmul.mubr.msk.f32.vlgmr.msra.gmra.mrb[8].mxu0 %vm750_vm2, %v2613_v25 }
 0x1d7   : > { %2687 = vmatpush3.xpose.msk.msra.mxu0 %vm750_vm2, %v1596_v37  ;;  %2688 = vmatprep.mubr.msk.f32.mxu0 %vm3077_vm1, %v3076_v16 }
 0x1d8   : > { %2696 = vmatprep.subr.mxu0 %v3076_v16  ;;  %v1929_v42 = vpop.permute.xlu1 %1928 }
 0x1d9   : > { %v1931_v41 = vpop.permute.xlu0 %1930 }
 0x1da   : > { %2689 = vmatmul.mubr.msk.f32.vlgmr.msra.gmra.mrb[10].mxu0 %vm750_vm2, %v1594_v38 }
 0x1db   : > { %2697 = vmatpush3.xpose.msk.msra.mxu0 %vm750_vm2, %v1764_v39  ;;  %2698 = vmatprep.mubr.msk.f32.mxu0 %vm3077_vm1, %v3076_v16 }
 0x1dc   : > { %2706 = vmatprep.subr.mxu0 %v3076_v16 }
 0x1de   : > { %2699 = vmatmul.mubr.msk.f32.vlgmr.msra.gmra.mrb[12].mxu0 %vm750_vm2, %v1762_v40 }
 0x1df   : > { %2707 = vmatpush3.xpose.msk.msra.mxu0 %vm750_vm2, %v1931_v41  ;;  %2708 = vmatprep.mubr.msk.f32.mxu0 %vm3077_vm1, %v3076_v16 }
 0x1e2   : > { %2709 = vmatmul.mubr.msk.f32.vlgmr.msra.gmra.mrb[14].mxu0 %vm750_vm2, %v1929_v42 }
 0x229   : > { %v823_v43 = vpop.f32.mrb[4].mxu1 }
 0x22a   : > { %v2640_v44 = vpop.f32.mrb[5].mxu1  ;;  %v828_v45 = vsel %vm827_vm3, %v823_v43, -inf }
 0x22b   : > { %829 = vmax.xlane.f32.xlu0 %v828_v45 }
 0x29d   : > { %v987_v46 = vpop.f32.mrb[2].mxu0 }
 0x29e   : > { %v2650_v47 = vpop.f32.mrb[3].mxu0  ;;  %v991_v48 = vsel %vm827_vm3, %v987_v46, -inf }
 0x29f   : > { %992 = vmax.xlane.f32.xlu1 %v991_v48 }
 0x2a1   : > { %v1155_v49 = vpop.f32.mrb[4].mxu0 }
 0x2a2   : > { %v2660_v50 = vpop.f32.mrb[5].mxu0  ;;  %v1159_v51 = vsel %vm827_vm3, %v1155_v49, -inf }
 0x2a3   : > { %1160 = vmax.xlane.f32.xlu0 %v1159_v51 }
 0x2a5   : > { %v1322_v52 = vpop.f32.mrb[6].mxu0 }
 0x2a6   : > { %v2670_v53 = vpop.f32.mrb[7].mxu0  ;;  %v1326_v54 = vsel %vm827_vm3, %v1322_v52, -inf }
 0x2a7   : > { %1327 = vmax.xlane.f32.xlu0 %v1326_v54 }
 0x2a9   : > { %v1503_v55 = vpop.f32.mrb[8].mxu0 }
 0x2aa   : > { %v2680_v56 = vpop.f32.mrb[9].mxu0  ;;  %v1507_v57 = vsel %vm827_vm3, %v1503_v55, -inf }
 0x2ab   : > { %1508 = vmax.xlane.f32.xlu1 %v1507_v57 }
 0x2ad   : > { %v1667_v58 = vpop.f32.mrb[10].mxu0 }
 0x2ae   : > { %v2690_v59 = vpop.f32.mrb[11].mxu0  ;;  %v1671_v60 = vsel %vm827_vm3, %v1667_v58, -inf }
 0x2af   : > { %1672 = vmax.xlane.f32.xlu0 %v1671_v60 }
 0x2b1   : > { %v1835_v61 = vpop.f32.mrb[12].mxu0 }
 0x2b2   : > { %v2700_v62 = vpop.f32.mrb[13].mxu0  ;;  %v1839_v63 = vsel %vm827_vm3, %v1835_v61, -inf }
 0x2b3   : > { %1840 = vmax.xlane.f32.xlu1 %v1839_v63 }
 0x2b5   : > { %v2002_v0 = vpop.f32.mrb[14].mxu0 }
 0x2b6   : > { %v2710_v1 = vpop.f32.mrb[15].mxu0  ;;  %v2006_v2 = vsel %vm827_vm3, %v2002_v0, -inf }
 0x2b7   : > { %2007 = vmax.xlane.f32.xlu0 %v2006_v2 }
 0x2b8   : > { %v830_v3 = vpop.xlane.xlu0 %829 }
 0x2b9   : > { %v831_v4 = vsub.f32 %v823_v43, %v830_v3 }
 0x2bb   : > { %v832_v6 = vmul.f32 1.442695, %v831_v4 }
 0x2bd   : > { %2875 = vpow2.f32 %v832_v6 }
 0x2c4   : > { %1005 = vrot.lane.b32.xlu1 %v3365_v32, %s3079_s16 }
 0x2c7   : > { %v2876_v7 = vpop.eup %2875 }
 0x2c8   : > { %v834_v8 = vsel %vm827_vm3, %v2876_v7, 0.0 }
 0x2e8   : > { %835 = vadd.xlane.f32.xlu1 %v834_v8 }
 0x2f9   : > { %1339 = vrot.lane.b32.xlu1 %v3365_v32, %s3080_s19 }
 0x32c   : > { %v993_v9 = vpop.xlane.xlu1 %992 }
 0x32d   : > { %v994_v10 = vsub.f32 %v987_v46, %v993_v9 }
 0x32f   : > { %v995_v11 = vmul.f32 1.442695, %v994_v10 }
 0x330   : > { %v1161_v13 = vpop.xlane.xlu0 %1160 }
 0x331   : > { %2877 = vpow2.f32 %v995_v11  ;;  %v1162_v14 = vsub.f32 %v1155_v49, %v1161_v13 }
 0x333   : > { %v1163_v15 = vmul.f32 1.442695, %v1162_v14 }
 0x334   : > { %v1328_v21 = vpop.xlane.xlu0 %1327 }
 0x335   : > { %2879 = vpow2.f32 %v1163_v15  ;;  %v1329_v22 = vsub.f32 %v1322_v52, %v1328_v21  ;;  %v2110_v21 = vld [vmem:[%s3630_s6] sm:$0xff] }
 0x337   : > { %v1330_v26 = vmul.f32 1.442695, %v1329_v22 }
 0x338   : > { %v1509_v23 = vpop.xlane.xlu1 %1508 }
 0x339   : > { %v1510_v25 = vsub.f32 %v1503_v55, %v1509_v23  ;;  %2881 = vpow2.f32 %v1330_v26  ;;  %v2112_v23 = vld [vmem:[%s3630_s6 + $0x10] sm:$0xff]  ;;  %v2114_v26 = vld [vmem:[%s3630_s6 + $0x20] sm:$0xff] }
 0x33b   : > { %v3415_v17 = vpop.eup %2877  ;;  %v1511_v30 = vmul.f32 1.442695, %v1510_v25 }
 0x33c   : > { %v997_v18 = vsel %vm827_vm3, %v3415_v17, 0.0  ;;  %v1673_v24 = vpop.xlane.xlu0 %1672 }
 0x33d   : > { %998 = vadd.xlane.f32.xlu0 %v997_v18  ;;  %v1674_v27 = vsub.f32 %v1667_v58, %v1673_v24  ;;  %2883 = vpow2.f32 %v1511_v30  ;;  %v2113_v24 = vld [vmem:[%s3630_s6 + $0x18] sm:$0xff] }
 0x33e   : > { %v2763_v25 = vpack.c.bf16 %v2113_v24, %v2112_v23  ;;  %v2117_v30 = vld [vmem:[%s3630_s6 + $0x38] sm:$0xff] }
 0x33f   : > { %v3419_v19 = vpop.eup %2879  ;;  %v1675_v34 = vmul.f32 1.442695, %v1674_v27  ;;  %v2115_v27 = vld [vmem:[%s3630_s6 + $0x28] sm:$0xff] }
 0x340   : > { %v1165_v20 = vsel %vm827_vm3, %v3419_v19, 0.0  ;;  %v1841_v28 = vpop.xlane.xlu1 %1840 }
 0x341   : > { %1166 = vadd.xlane.f32.xlu1 %v1165_v20  ;;  %v1842_v33 = vsub.f32 %v1835_v61, %v1841_v28  ;;  %2885 = vpow2.f32 %v1675_v34  ;;  %v2767_v28 = vpack.c.bf16 %v2115_v27, %v2114_v26 }
 0x343   : > { %v1843_v36 = vmul.f32 1.442695, %v1842_v33 }
 0x344   : > { %v2008_v29 = vpop.xlane.xlu0 %2007  ;;  %v1006_v39 = vpop.permute.xlu1 %1005 }
 0x345   : > { %v2009_v35 = vsub.f32 %v2002_v0, %v2008_v29  ;;  %2887 = vpow2.f32 %v1843_v36  ;;  %v2116_v29 = vld [vmem:[%s3630_s6 + $0x30] sm:$0xff] }
 0x346   : > { %v2771_v34 = vpack.c.bf16 %v2117_v30, %v2116_v29 }
 0x347   : > { %v2010_v37 = vmul.f32 1.442695, %v2009_v35 }
 0x349   : > { %2889 = vpow2.f32 %v2010_v37 }
 0x352   : > { %1685 = vrot.lane.b32.xlu1 %v3362_v31, %s3079_s16  ;;  %s460_s16 = scalar_lea.vmem [#allocation8], %s2483_s28 }
 0x353   : > { %1172 = vrot.lane.b32.xlu0 %v3365_v32, %s3078_s14  ;;  %v2882_v32 = vpop.eup %2881 }
 0x354   : > { %v3427_v38 = vpop.eup %2883  ;;  %v1332_v40 = vsel %vm827_vm3, %v2882_v32, 0.0 }
 0x355   : > { %v3430_v41 = vpop.eup %2885  ;;  %v1513_v44 = vsel %vm827_vm3, %v3427_v38, 0.0 }
 0x356   : > { %v3432_v42 = vpop.eup %2887  ;;  %v1677_v45 = vsel %vm827_vm3, %v3430_v41, 0.0 }
 0x357   : > { %v3438_v46 = vpop.eup %2889  ;;  %v1845_v47 = vsel %vm827_vm3, %v3432_v42, 0.0 }
 0x358   : > { %v2012_v48 = vsel %vm827_vm3, %v3438_v46, 0.0 }
 0x372   : > { %1333 = vadd.xlane.f32.xlu0 %v1332_v40 }
 0x375   : > { %v836_v43 = vpop.xlane.xlu1 %835 }
 0x376   : > { %2891 = vrcp.f32 %v836_v43  ;;  %1514 = vadd.xlane.f32.xlu1 %v1513_v44  ;;  %1678 = vadd.xlane.f32.xlu0 %v1677_v45 }
 0x379   : > { %v1340_v51 = vpop.permute.xlu1 %1339 }
 0x37a   : > { %1846 = vadd.xlane.f32.xlu1 %v1845_v47  ;;  %2013 = vadd.xlane.f32.xlu0 %v2012_v48 }
 0x380   : > { %v2892_v49 = vpop.eup %2891 }
 0x381   : > { %v838_v50 = vmul.f32 %v2892_v49, %v2876_v7 }
 0x383   : > { %839 = vst.msk [vmem:[%s3445_s11] sm:$0xff] %vm827_vm3, %v838_v50  ;;  %2644 = vmatmul.mubr.msk.f32.vlgmr.msra.gmra.mrb[6].mxu1 %vm827_vm3, %v838_v50 }
 0x384   : > { %2652 = vmatpush3.msra.mxu1 %v1006_v39  ;;  %2653 = vmatprep.mubr.msk.f32.mxu1 %vm3077_vm1, %v3076_v16 }
 0x385   : > { %2661 = vmatprep.subr.mxu1 %v3076_v16 }
 0x38b   : > { %2019 = vrot.lane.b32.xlu1 %v3362_v31, %s3080_s19  ;;  %s2279_s19 = sshll.u32 %s460_s16, 4  ;;  %s3559_s19 = int_to_ptr.vmem [resolvable:$true] %s2279_s19 }
 0x390   : > { %1852 = vrot.lane.b32.xlu0 %v3362_v31, %s3078_s14  ;;  %s2541_s14 = sshll.u32 %s3175_s21, 8 }
 0x391   : > { %s3557_s22 = scalar_lea.hbm %s3634_s10, %s2541_s14 }
 0x3ca   : > { %v999_v52 = vpop.xlane.xlu0 %998 }
 0x3cb   : > { %2893 = vrcp.f32 %v999_v52 }
 0x3ce   : > { %v1167_v53 = vpop.xlane.xlu1 %1166  ;;  %v1173_v56 = vpop.permute.xlu0 %1172 }
 0x3cf   : > { %2895 = vrcp.f32 %v1167_v53 }
 0x3d2   : > { %v1686_v59 = vpop.permute.xlu1 %1685 }
 0x3d5   : > { %v2894_v54 = vpop.eup %2893 }
 0x3d6   : > { %v1001_v55 = vmul.f32 %v2894_v54, %v3415_v17 }
 0x3d8   : > { %2502 = vst.msk [vmem:[%s3445_s11 + $0x10] sm:$0xff] %vm827_vm3, %v1001_v55  ;;  %2654 = vmatmul.mubr.msk.f32.vlgmr.msra.gmra.mrb[8].mxu1 %vm827_vm3, %v1001_v55  ;;  %v2528_v55 = vld [vmem:[%s3631_s7] ss:$0 sm:$0xff] }
 0x3d9   : > { %v2896_v57 = vpop.eup %2895  ;;  %2662 = vmatpush3.msra.mxu1 %v1173_v56  ;;  %2663 = vmatprep.mubr.msk.f32.mxu1 %vm3077_vm1, %v3076_v16 }
 0x3da   : > { %v1169_v58 = vmul.f32 %v2896_v57, %v3419_v19  ;;  %2671 = vmatprep.subr.mxu1 %v3076_v16 }
 0x3dc   : > { %2506 = vst.msk [vmem:[%s3445_s11 + $0x20] sm:$0xff] %vm827_vm3, %v1169_v58  ;;  %2664 = vmatmul.mubr.msk.f32.vlgmr.msra.gmra.mrb[10].mxu1 %vm827_vm3, %v1169_v58 }
 0x3dd   : > { %2672 = vmatpush3.msra.mxu1 %v1340_v51  ;;  %2673 = vmatprep.mubr.msk.f32.mxu1 %vm3077_vm1, %v3076_v16 }
 0x3de   : > { %2681 = vmatprep.subr.mxu1 %v3076_v16 }
 0x3ff   : > { %v1334_v60 = vpop.xlane.xlu0 %1333 }
 0x400   : > { %2897 = vrcp.f32 %v1334_v60 }
 0x403   : > { %v1515_v61 = vpop.xlane.xlu1 %1514  ;;  %v1679_v62 = vpop.xlane.xlu0 %1678 }
 0x404   : > { %2899 = vrcp.f32 %v1515_v61 }
 0x405   : > { %2901 = vrcp.f32 %v1679_v62 }
 0x407   : > { %v1847_v63 = vpop.xlane.xlu1 %1846  ;;  %v2014_v0 = vpop.xlane.xlu0 %2013 }
 0x408   : > { %2903 = vrcp.f32 %v1847_v63 }
 0x409   : > { %2905 = vrcp.f32 %v2014_v0 }
 0x40a   : > { %v2898_v1 = vpop.eup %2897 }
 0x40b   : > { %v1336_v2 = vmul.f32 %v2898_v1, %v2882_v32  ;;  %v1853_v11 = vpop.permute.xlu0 %1852  ;;  %v2020_v13 = vpop.permute.xlu1 %2019 }
 0x40d   : > { %2510 = vst.msk [vmem:[%s3445_s11 + $0x30] sm:$0xff] %vm827_vm3, %v1336_v2  ;;  %2674 = vmatmul.mubr.msk.f32.vlgmr.msra.gmra.mrb[12].mxu1 %vm827_vm3, %v1336_v2 }
 0x40e   : > { %v2900_v3 = vpop.eup %2899  ;;  %2682 = vmatpush3.msra.mxu1 %v3362_v31  ;;  %2683 = vmatprep.mubr.msk.f32.mxu1 %vm3077_vm1, %v3076_v16 }
 0x40f   : > { %v2902_v4 = vpop.eup %2901  ;;  %v1517_v6 = vmul.f32 %v2900_v3, %v3427_v38  ;;  %2691 = vmatprep.subr.mxu1 %v3076_v16 }
 0x410   : > { %v1681_v7 = vmul.f32 %v2902_v4, %v3430_v41 }
 0x411   : > { %2514 = vst.msk [vmem:[%s3445_s11 + $0x8] sm:$0xff] %vm827_vm3, %v1517_v6  ;;  %2684 = vmatmul.mubr.msk.f32.vlgmr.msra.gmra.mrb[14].mxu1 %vm827_vm3, %v1517_v6 }
 0x412   : > { %v2904_v8 = vpop.eup %2903  ;;  %2518 = vst.msk [vmem:[%s3445_s11 + $0x18] sm:$0xff] %vm827_vm3, %v1681_v7  ;;  %2692 = vmatpush3.msra.mxu1 %v1686_v59  ;;  %2693 = vmatprep.mubr.msk.f32.mxu1 %vm3077_vm1, %v3076_v16 }
 0x413   : > { %v2906_v31 = vpop.eup %2905  ;;  %v1849_v9 = vmul.f32 %v2904_v8, %v3432_v42  ;;  %2701 = vmatprep.subr.mxu1 %v3076_v16 }
 0x414   : > { %v2016_v10 = vmul.f32 %v2906_v31, %v3438_v46 }
 0x415   : > { %2522 = vst.msk [vmem:[%s3445_s11 + $0x28] sm:$0xff] %vm827_vm3, %v1849_v9  ;;  %2694 = vmatmul.mubr.msk.f32.vlgmr.msra.gmra.mrb[16].mxu1 %vm827_vm3, %v1681_v7 }
 0x416   : > { %2526 = vst.msk [vmem:[%s3445_s11 + $0x38] sm:$0xff] %vm827_vm3, %v2016_v10  ;;  %2702 = vmatpush3.msra.mxu1 %v1853_v11  ;;  %2703 = vmatprep.mubr.msk.f32.mxu1 %vm3077_vm1, %v3076_v16 }
 0x417   : > { %2711 = vmatprep.subr.mxu1 %v3076_v16 }
 0x419   : > { %2704 = vmatmul.mubr.msk.f32.vlgmr.msra.gmra.mrb[18].mxu1 %vm827_vm3, %v1849_v9 }
 0x41a   : > { %2712 = vmatpush3.msra.mxu1 %v2020_v13  ;;  %2713 = vmatprep.mubr.msk.f32.mxu1 %vm3077_vm1, %v3076_v16  ;;  %v2111_v16 = vld [vmem:[%s3630_s6 + $0x8] sm:$0xff] }
 0x41b   : > { %v2759_v22 = vpack.c.bf16 %v2111_v16, %v2110_v21  ;;  %v2532_v16 = vld [vmem:[%s3633_s9] ss:$0 sm:$0xff] }
 0x41d   : > { %2714 = vmatmul.mubr.msk.f32.vlgmr.msra.gmra.mrb[20].mxu1 %vm827_vm3, %v2016_v10  ;;  %2760 = vmatprep.subr.bf16.mxu0 %v2759_v22 }
 0x41e   : > { %2762 = vmatpush3.bf16.msra.mxu0 %v2759_v22 }
 0x41f   : > { %2764 = vmatprep.subr.bf16.mxu0 %v2763_v25 }
 0x422   : > { %2766 = vmatpush3.bf16.msra.mxu0 %v2763_v25 }
 0x423   : > { %2768 = vmatprep.subr.bf16.mxu0 %v2767_v28 }
 0x426   : > { %2770 = vmatpush3.bf16.msra.mxu0 %v2767_v28 }
 0x427   : > { %2772 = vmatprep.subr.bf16.mxu0 %v2771_v34 }
 0x42a   : > { %2774 = vmatpush3.bf16.msra.mxu0 %v2771_v34 }
 0x456   : > { %v909_v14 = vpop.f32.mrb[6].mxu1 }
 0x457   : > { %v2645_v15 = vpop.f32.mrb[7].mxu1 }
 0x4ab   : > { %v1077_v17 = vpop.f32.mrb[8].mxu1 }
 0x4ac   : > { %1416 = vrot.lane.b32.xlu0 %v1077_v17, %s3081_s23  ;;  %v2655_v18 = vpop.f32.mrb[9].mxu1 }
 0x4af   : > { %v1244_v19 = vpop.f32.mrb[10].mxu1 }
 0x4b0   : > { %1420 = vrot.lane.b32.xlu1 %v1244_v19, %s3082_s13  ;;  %v2665_v20 = vpop.f32.mrb[11].mxu1 }
 0x4b1   : > { %v2531_v20 = vld [vmem:[%s3632_s8] ss:$0 sm:$0xff] }
 0x4e0   : > { %v1411_v33 = vpop.f32.mrb[12].mxu1 }
 0x4e1   : > { %1424 = vrot.lane.b32.xlu1 %v1411_v33, %s3083_s26  ;;  %v2675_v35 = vpop.f32.mrb[13].mxu1 }
 0x4e4   : > { %v1589_v36 = vpop.f32.mrb[14].mxu1 }
 0x4e5   : > { %v2685_v37 = vpop.f32.mrb[15].mxu1 }
 0x4e8   : > { %v1757_v32 = vpop.f32.mrb[16].mxu1 }
 0x4e9   : > { %2096 = vrot.lane.b32.xlu0 %v1757_v32, %s3081_s23  ;;  %v2695_v38 = vpop.f32.mrb[17].mxu1  ;;  %s3084_s23 = smov [#allocation8]  }
 0x4ec   : > { %v1924_v39 = vpop.f32.mrb[18].mxu1 }
 0x4ed   : > { %2100 = vrot.lane.b32.xlu0 %v1924_v39, %s3082_s13  ;;  %v2705_v40 = vpop.f32.mrb[19].mxu1  ;;  %s2999_s13 = sshll.u32 %s3084_s23, 4  ;;  %s3000_s13 = int_to_ptr.vmem [resolvable:$false] %s2999_s13 }
 0x4ee   : > { %s3001_s17 = scalar_lea.vmem %s3000_s13, 512  ;;  %p3002_p13 = scmp.lt.s32.totalorder %s3559_s19, %s3000_s13 }
 0x4f0   : > { %v2091_v41 = vpop.f32.mrb[20].mxu1 }
 0x4f1   : > { %2104 = vrot.lane.b32.xlu1 %v2091_v41, %s3083_s26  ;;  %v2715_v42 = vpop.f32.mrb[21].mxu1  ;;  %s2995_s26 = scalar_lea.vmem %s3559_s19, 256 }
 0x4f2   : > { %p2996_p12 = scmp.ne.s32.totalorder %s3559_s19, %s2995_s26  ;;  %p3003_p1 = scmp.lt.s32.totalorder %s3001_s17, %s2995_s26 }
 0x4f4   : > { %p2997_p8 = pnand %p2996_p12, %p3662_p7  ;;  %p3004_p6 = por %p3003_p1, %p3002_p13 }
 0x4f6   : > { %p2998_p11 = pneg %p2997_p8 }
 0x4f8   : > { %p3005_p9 = pnand %p3004_p6, %p2998_p11 }
 0x51e   : > { %v1417_v43 = vpop.permute.xlu0 %1416 }
 0x51f   : > { %v1427_v45 = vsel %vm750_vm2, %v909_v14, %v1417_v43 }
 0x522   : > { %v1421_v44 = vpop.permute.xlu1 %1420 }
 0x523   : > { %v1428_v46 = vsel %vm498_vm0, %v1427_v45, %v1421_v44 }
 0x553   : > { %v1425_v47 = vpop.permute.xlu1 %1424 }
 0x554   : > { %v1430_v48 = vsel %vm1429_vm4, %v1428_v46, %v1425_v47 }
 0x555   : > { %2732 = vmatprep.mubr.msk.f32.mxu0 %vm2125_vm5, %v1430_v48 }
 0x55b   : > { %v2097_v49 = vpop.permute.xlu0 %2096 }
 0x55c   : > { %v2107_v51 = vsel %vm750_vm2, %v1589_v36, %v2097_v49 }
 0x55f   : > { %v2101_v50 = vpop.permute.xlu0 %2100 }
 0x560   : > { %v2108_v52 = vsel %vm498_vm0, %v2107_v51, %v2101_v50 }
 0x563   : > { %v2105_v53 = vpop.permute.xlu1 %2104 }
 0x564   : > { %v2109_v54 = vsel %vm1429_vm4, %v2108_v52, %v2105_v53 }
 0x565   : > { %2733 = vmatmul.mubr.msk.f32.vlgmr.msra.gmra.mrb[16].mxu0 %vm2125_vm5, %v2109_v54 }
 0x638   : > { %v2734_v56 = vpop.f32.mrb[16].mxu0 }
 0x639   : > { %v2204_v57 = vadd.f32 %v2734_v56, %v2528_v55  ;;  %v2198_v58 = vpop.f32.mrb[17].mxu0 }
 0x63a   : > { %v2199_v59 = vadd.f32 %v2528_v55, %v2198_v58 }
 0x63b   : > { %v2208_v60 = vadd.f32 %v2204_v57, %v3326_v12 }
 0x63c   : > { %v2207_v61 = vadd.f32 %v2199_v59, %v3318_v5 }
 0x63d   : > { %v2212_v62 = vsel %vm498_vm0, %v2208_v60, 0.0  ;;  %v2219_v2 = vmul.f32 %v2208_v60, %v2208_v60 }
 0x63e   : > { %2213 = vadd.xlane.f32.xlu1 %v2212_v62  ;;  %v2209_v63 = vsel %vm498_vm0, %v2207_v61, 0.0  ;;  %v2218_v0 = vmul.f32 %v2207_v61, %v2207_v61 }
 0x63f   : > { %2210 = vadd.xlane.f32.xlu0 %v2209_v63  ;;  %v2223_v3 = vsel %vm498_vm0, %v2219_v2, 0.0 }
 0x640   : > { %v2220_v1 = vsel %vm498_vm0, %v2218_v0, 0.0 }
 0x643   : > { %2221 = vadd.xlane.f32.xlu0 %v2220_v1 }
 0x647   : > { %2224 = vadd.xlane.f32.xlu0 %v2223_v3 }
 0x6cb   : > { %v2214_v7 = vpop.xlane.xlu1 %2213 }
 0x6cc   : > { %v2211_v4 = vpop.xlane.xlu0 %2210  ;;  %v2217_v8 = vmul.f32 0.03125, %v2214_v7 }
 0x6cd   : > { %v2216_v6 = vmul.f32 0.03125, %v2211_v4 }
 0x6ce   : > { %v2229_v11 = vmul.f32 %v2217_v8, %v2217_v8  ;;  %v2233_v22 = vsub.f32 %v2208_v60, %v2217_v8 }
 0x6cf   : > { %v2228_v5 = vmul.f32 %v2216_v6, %v2216_v6  ;;  %v2232_v18 = vsub.f32 %v2207_v61, %v2216_v6 }
 0x6d0   : > { %v2222_v12 = vpop.xlane.xlu0 %2221 }
 0x6d1   : > { %v2226_v31 = vmul.f32 0.03125, %v2222_v12 }
 0x6d3   : > { %v2230_v9 = vsub.f32 %v2226_v31, %v2228_v5 }
 0x6d4   : > { %v2225_v10 = vpop.xlane.xlu0 %2224 }
 0x6d5   : > { %v2234_v13 = vadd.f32 1e-06, %v2230_v9  ;;  %v2227_v14 = vmul.f32 0.03125, %v2225_v10 }
 0x6d7   : > { %2907 = vrsqrt.f32 %v2234_v13  ;;  %v2231_v15 = vsub.f32 %v2227_v14, %v2229_v11 }
 0x6d9   : > { %v2235_v17 = vadd.f32 1e-06, %v2231_v15 }
 0x6db   : > { %2909 = vrsqrt.f32 %v2235_v17 }
 0x6e1   : > { %v2908_v19 = vpop.eup %2907 }
 0x6e2   : > { %v2238_v21 = vmul.f32 %v2908_v19, %v2232_v18 }
 0x6e4   : > { %v2247_v23 = vmul.f32 %v2531_v20, %v2238_v21 }
 0x6e5   : > { %v2910_v24 = vpop.eup %2909 }
 0x6e6   : > { %v2256_v25 = vadd.f32 %v2532_v16, %v2247_v23  ;;  %v2239_v26 = vmul.f32 %v2910_v24, %v2233_v22 }
 0x6e8   : > { %v2248_v27 = vmul.f32 %v2531_v20, %v2239_v26  ;;  %2258 = vst.msk [vmem:[%s460_s16] sm:$0xff] %vm498_vm0, %v2256_v25 }
 0x6ea   : > { %v2257_v28 = vadd.f32 %v2532_v16, %v2248_v27 }
 0x6ec   : > { %2259 = vst.msk [vmem:[%s460_s16 + $0x8] sm:$0xff] %vm498_vm0, %v2257_v28 }
 0x6ed   : > { %3008 = shalt.err (!%p3005_p9)
}
 0x6ee   : > { %s3009_s20 = scalar_lea.hbm %s3557_s22, 256  ;;  %s3013_s30 = scalar_lea.hbm %s3634_s10, 512 }
 0x6ef   : > { %p3010_p2 = scmp.ne.s32.totalorder %s3557_s22, %s3009_s20  ;;  %p3014_p5 = scmp.lt.u32.totalorder %s3557_s22, %s3634_s10 }
 0x6f0   : > { %p3015_p10 = scmp.lt.u32.totalorder %s3013_s30, %s3009_s20  ;;  %p3017_p12 = scmp.lt.u32.totalorder %s3009_s20, %s3557_s22 }
 0x6f1   : > { %p3011_p0 = pnand %p3010_p2, %p3662_p7 }
 0x6f2   : > { %p3016_p4 = por %p3015_p10, %p3014_p5 }
 0x6f3   : > { %p3012_p3 = pneg %p3011_p0 }
 0x6f4   : > { %p3018_p8 = por %p3017_p12, %p3016_p4 }
 0x6f6   : > { %p3019_p11 = pnand %p3018_p8, %p3012_p3 }
 0x6f8   : > { %3022 = shalt.err (!%p3019_p11)
}
 0x6f9   : > { %s3085_s29 = smov 128   ;;  %s3086_s26 = smov 8  }
 0x6fa   : > { %2787 = dma.vmem_to_hbm [thread:$0]  (%p3662_p7), %s3559_s19, 256, %s3557_s22, %s2261_s24, %s3085_s29, %s3085_s29, %s3086_s26  }
 0x6fb   : > { %s2266_s23 = scalar_lea.sflag [#allocation10], %s3411_s12 }
 0x6fc   : > { %s3663_s28 = sld [smem:[#allocation23_spill]]  ;;  %s2311_s25 = sshll.u32 %s3445_s11, 4  ;;  %s2312_s25 = int_to_ptr.vmem [resolvable:$true] %s2311_s25 }
 0x6fd   : > { %s3087_s30 = smov 256   ;;  %s3088_s12 = smov 512  }
 0x6fe   : > { %2788 = sst [smem:[#allocation12]] (%p3662_p7), %s3087_s30  ;;  %s3089_s21 = smov 2  }
 0x6ff   : > { %2789 = sst [smem:[#allocation12 + $0x1]] (%p3662_p7), %s3088_s12  ;;  %s3090_s19 = smov 128  }
 0x700   : > { %2790 = sst [smem:[#allocation12 + $0x2]] (%p3662_p7), %s3089_s21  ;;  %s3091_s22 = smov 8  }
 0x701   : > { %2791 = sst [smem:[#allocation12 + $0x3]] (%p3662_p7), %s3090_s19  ;;  %s3093_s11 = smov 0  }
 0x702   : > { %s2294_s20 = scalar_lea.hbm %s3663_s28, %s2541_s14  ;;  %2792 = sst [smem:[#allocation12 + $0x4]] (%p3662_p7), %s3090_s19 }
 0x703   : > { %2793 = sst [smem:[#allocation12 + $0x5]] (%p3662_p7), %s3091_s22  ;;  %s3092_s14 = smov [#allocation11]  }
 0x704   : > { %2794 = dma.general (%p3662_p7), %s2312_s25, 1024, %s2294_s20, %s2266_s23, %s3092_s14, [#allocation12], %s3093_s11, 0  }
 0x705 PF: > { %s3664_s24 = sld [smem:[#allocation19_spill]]  ;;  %s3665_s16 = sld [smem:[#allocation17_spill]] }
 0x706   : > { %s3666_s15 = sld [smem:[#allocation22_spill]] }
 0x70b   : > { %p2820_p13 = scmp.ge.s32.totalorder %s3664_s24, 2  ;;  %s2339_s29 = sand.u32 1, %s3665_s16  }
 0x70c   : > { %p3667_p1 = scmp.ne.s32.totalorder %s3666_s15, 0  ;;  %s2340_s26 = scalar_lea.sflag [#allocation4], %s2339_s29 }
 0x70e   : > { %p2808_p6 = pnand %p2820_p13, %p3667_p1 }
 0x710   : > { %3048 = dma.done.wait (!%p2808_p6), %s2340_s26, 256  }
 0x711   : > { %3050 = vsyncadd (!%p2808_p6), %s2340_s26, 4294967040  ;;  %s2349_s13 = scalar_lea.sflag [#allocation10], %s2339_s29 }
 0x712   : > { %3052 = dma.done.wait (!%p2808_p6), %s2349_s13, 1024  }
 0x713   : > { %3054 = vsyncadd (!%p2808_p6), %s2349_s13, 4294966272  ;;  %s3668_s20 = sld [smem:[#allocation20_spill]]  ;;  %s3669_s28 = sld [smem:[#allocation18_spill]] }
 0x714   : > { %s3670_s19 = sld [smem:[#allocation21_spill]]  ;;  %s3671_s17 = smov %s3061_s18 }
 0x719   : > { %p27_p7 = scmp.ge.s32.totalorder %s3668_s20, 4   ;;  %s3672_s18 = smov %s3669_s28 }
 0x71b   :  { %29 = sbr.rel (!%p27_p7) target bundleno = 9 (0x9), region = 143 }
 0x722   :  { %2354 = vsyncpa [#allocation3], 1 }
 0x723   :  { %2356 = vsyncpa [#allocation3 + $0x1], 1 }
 0x724   :  { %2357 = vsyncpa [#allocation6], 1 }
 0x725   :  { %2358 = vsyncpa [#allocation4], 1 }
 0x726   :  { %2360 = vsyncpa [#allocation4 + $0x1], 1 }
 0x727   :  { %2361 = vsyncpa [#allocation10], 1 }
 0x728   :  { %2363 = vsyncpa [#allocation10 + $0x1], 1 }

</bundles_post_ra>
